<compile_context>
chip_gen: v7x
topology: tpu7x:2x2x1
jax: 0.10.0
libtpu: 0.0.40
codegen_flags: <defaults>
</compile_context>

<pallas_src>
import functools

import jax
import jax.numpy as jnp
from jax.experimental import pallas as pl
from jax.experimental.pallas import tpu as pltpu

LN_EPS = 1e-5


# ----------------------------------------------------------------------------
# Fused encoder-layer kernel: one grid step == one batch element (L, D) block
# ----------------------------------------------------------------------------
def _encoder_layer_kernel(x_ref,
                          wqkv_ref, bqkv_ref, wo_ref, bo_ref,
                          w1_ref, b1_ref, w2_ref, b2_ref,
                          ln1g_ref, ln1b_ref, ln2g_ref, ln2b_ref,
                          o_ref, *, n_heads):
    x = x_ref[0]                                    # (L, D)
    L, D = x.shape
    dh = D // n_heads

    # ---- fused QKV projection (one wide MXU matmul) ----------------------
    # Q columns were pre-scaled by 1/sqrt(dh) on the host (exact fold).
    qkv = jnp.dot(x, wqkv_ref[...], preferred_element_type=jnp.float32) \
        + bqkv_ref[...]                             # (L, 3D)

    # ---- per-head softmax attention, out-proj folded per head ------------
    attn_out = jnp.zeros((L, D), jnp.float32)
    for h in range(n_heads):                        # static unroll (n_heads small)
        q_h = qkv[:,          h * dh:          (h + 1) * dh]
        k_h = qkv[:, D +      h * dh: D +      (h + 1) * dh]
        v_h = qkv[:, 2 * D +  h * dh: 2 * D +  (h + 1) * dh]
        s = jax.lax.dot_general(q_h, k_h, (((1,), (1,)), ((), ())),
                                preferred_element_type=jnp.float32)   # (L, L)
        s = s - jnp.max(s, axis=-1, keepdims=True)
        p = jnp.exp(s)
        p = p * pl.reciprocal(jnp.sum(p, axis=-1, keepdims=True), approx=True)
        ctx = jnp.dot(p, v_h, preferred_element_type=jnp.float32)     # (L, dh)
        # fold this head's slice of the output projection here -> no concat
        attn_out = attn_out + jnp.dot(ctx, wo_ref[h * dh:(h + 1) * dh, :],
                                      preferred_element_type=jnp.float32)
    attn_out = attn_out + bo_ref[...]

    # ---- residual + LayerNorm1 -------------------------------------------
    x1 = x + attn_out
    mu = jnp.mean(x1, axis=-1, keepdims=True)
    var = jnp.mean((x1 - mu) ** 2, axis=-1, keepdims=True)
    x1 = (x1 - mu) * jax.lax.rsqrt(var + LN_EPS) * ln1g_ref[...] + ln1b_ref[...]

    # ---- pointwise FFN: Conv1d(k=1) -> ReLU -> Conv1d(k=1) ----------------
    hdn = jnp.dot(x1, w1_ref[...], preferred_element_type=jnp.float32) + b1_ref[...]
    hdn = jnp.maximum(hdn, 0.0)                     # activation='relu' (module default)
    y = jnp.dot(hdn, w2_ref[...], preferred_element_type=jnp.float32) + b2_ref[...]

    # ---- residual + LayerNorm2 -------------------------------------------
    z = x1 + y
    mu = jnp.mean(z, axis=-1, keepdims=True)
    var = jnp.mean((z - mu) ** 2, axis=-1, keepdims=True)
    o_ref[0] = ((z - mu) * jax.lax.rsqrt(var + LN_EPS) * ln2g_ref[...]
                + ln2b_ref[...]).astype(o_ref.dtype)


def encoder_layer_forward(x, params, n_heads):
    B, L, D = x.shape
    F = params["w1"].shape[1]
    dh = D // n_heads
    scale = 1.0 / (dh ** 0.5)

    # One-time host-side prep (tiny, outside the kernel): fuse Q/K/V into one
    # (D, 3D) projection and fold the attention scale into the Q columns.
    wqkv = jnp.concatenate([params["wq"] * scale, params["wk"], params["wv"]], axis=1)
    bqkv = jnp.concatenate([params["bq"] * scale, params["bk"], params["bv"]], axis=1)

    def full(shape):
        # weight blocks: constant block index -> stay resident in VMEM
        return pl.BlockSpec(shape, lambda b: (0,) * len(shape))

    kernel = functools.partial(_encoder_layer_kernel, n_heads=n_heads)
    return pl.pallas_call(
        kernel,
        out_shape=jax.ShapeDtypeStruct((B, L, D), jnp.float32),
        grid=(B,),
        in_specs=[pl.BlockSpec((1, L, D), lambda b: (b, 0, 0)),
                  full((D, 3 * D)), full((1, 3 * D)),
                  full((D, D)), full((1, D)),
                  full((D, F)), full((1, F)), full((F, D)), full((1, D)),
                  full((1, D)), full((1, D)), full((1, D)), full((1, D))],
        out_specs=pl.BlockSpec((1, L, D), lambda b: (b, 0, 0)),
        compiler_params=pltpu.CompilerParams(
            dimension_semantics=("parallel",)),   # v7x: shard batch across 2 TCs
    )(x,
      wqkv, bqkv, params["wo"], params["bo"],
      params["w1"], params["b1"], params["w2"], params["b2"],
      params["ln1_g"], params["ln1_b"], params["ln2_g"], params["ln2_b"])


# ----------------------------------------------------------------------------
# Pure-JAX reference (ground truth for correctness check)
# ----------------------------------------------------------------------------
def ref_forward(x, params, n_heads):
    B, L, D = x.shape
    dh = D // n_heads
    hp = jax.lax.Precision.HIGHEST

    def lin(a, w, b):
        return jnp.dot(a, w, precision=hp) + b

    q = lin(x, params["wq"], params["bq"]).reshape(B, L, n_heads, dh)
    k = lin(x, params["wk"], params["bk"]).reshape(B, L, n_heads, dh)
    v = lin(x, params["wv"], params["bv"]).reshape(B, L, n_heads, dh)
    s = jnp.einsum("blhe,bshe->bhls", q, k, precision=hp) / (dh ** 0.5)
    a = jax.nn.softmax(s, axis=-1)
    ctx = jnp.einsum("bhls,bshd->blhd", a, v, precision=hp).reshape(B, L, D)
    attn_out = lin(ctx, params["wo"], params["bo"])

    def layer_norm(t, g, b):
        mu = jnp.mean(t, axis=-1, keepdims=True)
        var = jnp.mean((t - mu) ** 2, axis=-1, keepdims=True)
        return (t - mu) / jnp.sqrt(var + LN_EPS) * g + b

    x1 = layer_norm(x + attn_out, params["ln1_g"], params["ln1_b"])
    y = jnp.maximum(lin(x1, params["w1"], params["b1"]), 0.0)
    y = lin(y, params["w2"], params["b2"])
    return layer_norm(x1 + y, params["ln2_g"], params["ln2_b"])


# ----------------------------------------------------------------------------
def init_params(key, d_model, d_ff):
    D, F = d_model, d_ff

    def u(k, fan_in, shape):
        bound = 1.0 / (fan_in ** 0.5)
        return jax.random.uniform(k, shape, jnp.float32, -bound, bound)

    ks = jax.random.split(key, 17)
    params = {
        # attention projections stored as (in, out) so the kernel does x @ W
        "wq": u(ks[0], D, (D, D)), "bq": u(ks[1], D, (1, D)),
        "wk": u(ks[2], D, (D, D)), "bk": u(ks[3], D, (1, D)),
        "wv": u(ks[4], D, (D, D)), "bv": u(ks[5], D, (1, D)),
        "wo": u(ks[6], D, (D, D)), "bo": u(ks[7], D, (1, D)),
        # conv1: Conv1d(D, F, k=1) weight (F, D, 1) pre-permuted to (D, F)
        "w1": u(ks[8], D, (D, F)), "b1": u(ks[9], D, (1, F)),
        # conv2: Conv1d(F, D, k=1) weight (D, F, 1) pre-permuted to (F, D)
        "w2": u(ks[10], F, (F, D)), "b2": u(ks[11], F, (1, D)),
        "ln1_g": 1.0 + 0.1 * jax.random.normal(ks[12], (1, D), jnp.float32),
        "ln1_b": 0.1 * jax.random.normal(ks[13], (1, D), jnp.float32),
        "ln2_g": 1.0 + 0.1 * jax.random.normal(ks[14], (1, D), jnp.float32),
        "ln2_b": 0.1 * jax.random.normal(ks[15], (1, D), jnp.float32),
    }
    return params, ks[16]


if __name__ == "__main__":
    # small but lane-dense / MXU-friendly shapes: (B, L, d_model) = (2, 16, 128)
    B, L, d_model, n_heads = 2, 16, 128, 4
    d_ff = 4 * d_model
    key = jax.random.PRNGKey(0)
    params, key = init_params(key, d_model, d_ff)
    kx, _ = jax.random.split(key)
    x = jax.random.normal(kx, (B, L, d_model), jnp.float32)

    fwd = jax.jit(encoder_layer_forward, static_argnums=2)
    out = jax.block_until_ready(fwd(x, params, n_heads))

    ref = ref_forward(x, params, n_heads)
    assert out.shape == ref.shape == (B, L, d_model), (out.shape, ref.shape)
    max_err = float(jnp.max(jnp.abs(out - ref)))
    # Tolerance accounts for the MXU's default matmul precision and the EUP
    # approx-reciprocal softmax denominator vs the HIGHEST-precision reference;
    # genuine bugs produce O(0.1-1) errors.
    if (max_err > 3e-2) or (not bool(jnp.all(jnp.isfinite(out)))):
        raise SystemExit(f"mismatch vs reference: max abs err = {max_err}")
    print("KERNEL_OK")
</pallas_src>

<mosaic_0001>
module attributes {stable_mosaic.version = 11 : i64} {
  func.func @_encoder_layer_kernel(%arg0: i32, %arg1: memref<1x16x128xf32, #tpu.memory_space<vmem>>, %arg2: memref<128x384xf32, #tpu.memory_space<vmem>>, %arg3: memref<1x384xf32, #tpu.memory_space<vmem>>, %arg4: memref<128x128xf32, #tpu.memory_space<vmem>>, %arg5: memref<1x128xf32, #tpu.memory_space<vmem>>, %arg6: memref<128x512xf32, #tpu.memory_space<vmem>>, %arg7: memref<1x512xf32, #tpu.memory_space<vmem>>, %arg8: memref<512x128xf32, #tpu.memory_space<vmem>>, %arg9: memref<1x128xf32, #tpu.memory_space<vmem>>, %arg10: memref<1x128xf32, #tpu.memory_space<vmem>>, %arg11: memref<1x128xf32, #tpu.memory_space<vmem>>, %arg12: memref<1x128xf32, #tpu.memory_space<vmem>>, %arg13: memref<1x128xf32, #tpu.memory_space<vmem>>, %arg14: memref<1x16x128xf32, #tpu.memory_space<vmem>>) attributes {dimension_semantics = [#tpu.dimension_semantics<parallel>], iteration_bounds = array<i64: 2>, scalar_prefetch = 0 : i64, scratch_operands = 0 : i64, tpu.core_type = #tpu.core_type<tc>, window_params = [{transform_indices = @transform_0, window_bounds = array<i64: 1, 16, 128>}, {pipeline_mode = #tpu.pipeline_mode<synchronous>, transform_indices = @transform_1, window_bounds = array<i64: 128, 384>}, {pipeline_mode = #tpu.pipeline_mode<synchronous>, transform_indices = @transform_2, window_bounds = array<i64: 1, 384>}, {pipeline_mode = #tpu.pipeline_mode<synchronous>, transform_indices = @transform_3, window_bounds = array<i64: 128, 128>}, {pipeline_mode = #tpu.pipeline_mode<synchronous>, transform_indices = @transform_4, window_bounds = array<i64: 1, 128>}, {pipeline_mode = #tpu.pipeline_mode<synchronous>, transform_indices = @transform_5, window_bounds = array<i64: 128, 512>}, {pipeline_mode = #tpu.pipeline_mode<synchronous>, transform_indices = @transform_6, window_bounds = array<i64: 1, 512>}, {pipeline_mode = #tpu.pipeline_mode<synchronous>, transform_indices = @transform_7, window_bounds = array<i64: 512, 128>}, {pipeline_mode = #tpu.pipeline_mode<synchronous>, transform_indices = @transform_8, window_bounds = array<i64: 1, 128>}, {pipeline_mode = #tpu.pipeline_mode<synchronous>, transform_indices = @transform_9, window_bounds = array<i64: 1, 128>}, {pipeline_mode = #tpu.pipeline_mode<synchronous>, transform_indices = @transform_10, window_bounds = array<i64: 1, 128>}, {pipeline_mode = #tpu.pipeline_mode<synchronous>, transform_indices = @transform_11, window_bounds = array<i64: 1, 128>}, {pipeline_mode = #tpu.pipeline_mode<synchronous>, transform_indices = @transform_12, window_bounds = array<i64: 1, 128>}, {transform_indices = @transform_13, window_bounds = array<i64: 1, 16, 128>}]} {
    %c0 = arith.constant 0 : index
    %c0_0 = arith.constant 0 : index
    %c0_1 = arith.constant 0 : index
    %0 = vector.load %arg1[%c0, %c0_0, %c0_1] : memref<1x16x128xf32, #tpu.memory_space<vmem>>, vector<1x16x128xf32>
    %1 = vector.shape_cast %0 : vector<1x16x128xf32> to vector<16x128xf32>
    %c0_2 = arith.constant 0 : index
    %c0_3 = arith.constant 0 : index
    %2 = vector.load %arg2[%c0_2, %c0_3] : memref<128x384xf32, #tpu.memory_space<vmem>>, vector<128x384xf32>
    %cst = arith.constant dense<0.000000e+00> : vector<16x384xf32>
    %3 = tpu.matmul %1, %2, %cst {dimension_numbers = #tpu.dot_dimension_numbers<[1], [0], [0], [1], [0, 0, 1, 1], [], []>} : vector<16x128xf32>, vector<128x384xf32>, vector<16x384xf32> -> vector<16x384xf32>
    %c0_4 = arith.constant 0 : index
    %c0_5 = arith.constant 0 : index
    %4 = vector.load %arg3[%c0_4, %c0_5] : memref<1x384xf32, #tpu.memory_space<vmem>>, vector<1x384xf32>
    %5 = vector.broadcast %4 : vector<1x384xf32> to vector<16x384xf32>
    %6 = arith.addf %3, %5 : vector<16x384xf32>
    %cst_6 = arith.constant 0.000000e+00 : f32
    %7 = vector.broadcast %cst_6 : f32 to vector<16x128xf32>
    %8 = vector.extract_strided_slice %6 {offsets = [0, 0], sizes = [16, 32], strides = [1, 1]} : vector<16x384xf32> to vector<16x32xf32>
    %9 = vector.extract_strided_slice %6 {offsets = [0, 128], sizes = [16, 32], strides = [1, 1]} : vector<16x384xf32> to vector<16x32xf32>
    %10 = vector.extract_strided_slice %6 {offsets = [0, 256], sizes = [16, 32], strides = [1, 1]} : vector<16x384xf32> to vector<16x32xf32>
    %cst_7 = arith.constant dense<0.000000e+00> : vector<16x16xf32>
    %11 = tpu.matmul %8, %9, %cst_7 {dimension_numbers = #tpu.dot_dimension_numbers<[1], [1], [0], [0], [0, 0, 1, 0], [], []>} : vector<16x32xf32>, vector<16x32xf32>, vector<16x16xf32> -> vector<16x16xf32>
    %cst_8 = arith.constant dense<0xFF800000> : vector<16xf32>
    %12 = vector.multi_reduction <maximumf>, %11, %cst_8 [1] : vector<16x16xf32> to vector<16xf32>
    %13 = vector.shape_cast %12 : vector<16xf32> to vector<16x1xf32>
    %14 = vector.broadcast %13 : vector<16x1xf32> to vector<16x16xf32>
    %15 = arith.subf %11, %14 : vector<16x16xf32>
    %16 = math.exp %15 : vector<16x16xf32>
    %cst_9 = arith.constant dense<0.000000e+00> : vector<16xf32>
    %17 = vector.multi_reduction <add>, %16, %cst_9 [1] : vector<16x16xf32> to vector<16xf32>
    %18 = vector.shape_cast %17 : vector<16xf32> to vector<16x1xf32>
    %19 = tpu.reciprocal %18 {approx = true} : vector<16x1xf32> -> vector<16x1xf32>
    %20 = vector.broadcast %19 : vector<16x1xf32> to vector<16x16xf32>
    %21 = arith.mulf %16, %20 : vector<16x16xf32>
    %cst_10 = arith.constant dense<0.000000e+00> : vector<16x32xf32>
    %22 = tpu.matmul %21, %10, %cst_10 {dimension_numbers = #tpu.dot_dimension_numbers<[1], [0], [0], [1], [0, 0, 1, 1], [], []>} : vector<16x16xf32>, vector<16x32xf32>, vector<16x32xf32> -> vector<16x32xf32>
    %c0_11 = arith.constant 0 : index
    %c0_12 = arith.constant 0 : index
    %23 = vector.load %arg4[%c0_11, %c0_12] : memref<128x128xf32, #tpu.memory_space<vmem>>, vector<32x128xf32>
    %cst_13 = arith.constant dense<0.000000e+00> : vector<16x128xf32>
    %24 = tpu.matmul %22, %23, %cst_13 {dimension_numbers = #tpu.dot_dimension_numbers<[1], [0], [0], [1], [0, 0, 1, 1], [], []>} : vector<16x32xf32>, vector<32x128xf32>, vector<16x128xf32> -> vector<16x128xf32>
    %25 = arith.addf %7, %24 : vector<16x128xf32>
    %26 = vector.extract_strided_slice %6 {offsets = [0, 32], sizes = [16, 32], strides = [1, 1]} : vector<16x384xf32> to vector<16x32xf32>
    %27 = vector.extract_strided_slice %6 {offsets = [0, 160], sizes = [16, 32], strides = [1, 1]} : vector<16x384xf32> to vector<16x32xf32>
    %28 = vector.extract_strided_slice %6 {offsets = [0, 288], sizes = [16, 32], strides = [1, 1]} : vector<16x384xf32> to vector<16x32xf32>
    %cst_14 = arith.constant dense<0.000000e+00> : vector<16x16xf32>
    %29 = tpu.matmul %26, %27, %cst_14 {dimension_numbers = #tpu.dot_dimension_numbers<[1], [1], [0], [0], [0, 0, 1, 0], [], []>} : vector<16x32xf32>, vector<16x32xf32>, vector<16x16xf32> -> vector<16x16xf32>
    %cst_15 = arith.constant dense<0xFF800000> : vector<16xf32>
    %30 = vector.multi_reduction <maximumf>, %29, %cst_15 [1] : vector<16x16xf32> to vector<16xf32>
    %31 = vector.shape_cast %30 : vector<16xf32> to vector<16x1xf32>
    %32 = vector.broadcast %31 : vector<16x1xf32> to vector<16x16xf32>
    %33 = arith.subf %29, %32 : vector<16x16xf32>
    %34 = math.exp %33 : vector<16x16xf32>
    %cst_16 = arith.constant dense<0.000000e+00> : vector<16xf32>
    %35 = vector.multi_reduction <add>, %34, %cst_16 [1] : vector<16x16xf32> to vector<16xf32>
    %36 = vector.shape_cast %35 : vector<16xf32> to vector<16x1xf32>
    %37 = tpu.reciprocal %36 {approx = true} : vector<16x1xf32> -> vector<16x1xf32>
    %38 = vector.broadcast %37 : vector<16x1xf32> to vector<16x16xf32>
    %39 = arith.mulf %34, %38 : vector<16x16xf32>
    %cst_17 = arith.constant dense<0.000000e+00> : vector<16x32xf32>
    %40 = tpu.matmul %39, %28, %cst_17 {dimension_numbers = #tpu.dot_dimension_numbers<[1], [0], [0], [1], [0, 0, 1, 1], [], []>} : vector<16x16xf32>, vector<16x32xf32>, vector<16x32xf32> -> vector<16x32xf32>
    %c32 = arith.constant 32 : index
    %c0_18 = arith.constant 0 : index
    %41 = vector.load %arg4[%c32, %c0_18] : memref<128x128xf32, #tpu.memory_space<vmem>>, vector<32x128xf32>
    %cst_19 = arith.constant dense<0.000000e+00> : vector<16x128xf32>
    %42 = tpu.matmul %40, %41, %cst_19 {dimension_numbers = #tpu.dot_dimension_numbers<[1], [0], [0], [1], [0, 0, 1, 1], [], []>} : vector<16x32xf32>, vector<32x128xf32>, vector<16x128xf32> -> vector<16x128xf32>
    %43 = arith.addf %25, %42 : vector<16x128xf32>
    %44 = vector.extract_strided_slice %6 {offsets = [0, 64], sizes = [16, 32], strides = [1, 1]} : vector<16x384xf32> to vector<16x32xf32>
    %45 = vector.extract_strided_slice %6 {offsets = [0, 192], sizes = [16, 32], strides = [1, 1]} : vector<16x384xf32> to vector<16x32xf32>
    %46 = vector.extract_strided_slice %6 {offsets = [0, 320], sizes = [16, 32], strides = [1, 1]} : vector<16x384xf32> to vector<16x32xf32>
    %cst_20 = arith.constant dense<0.000000e+00> : vector<16x16xf32>
    %47 = tpu.matmul %44, %45, %cst_20 {dimension_numbers = #tpu.dot_dimension_numbers<[1], [1], [0], [0], [0, 0, 1, 0], [], []>} : vector<16x32xf32>, vector<16x32xf32>, vector<16x16xf32> -> vector<16x16xf32>
    %cst_21 = arith.constant dense<0xFF800000> : vector<16xf32>
    %48 = vector.multi_reduction <maximumf>, %47, %cst_21 [1] : vector<16x16xf32> to vector<16xf32>
    %49 = vector.shape_cast %48 : vector<16xf32> to vector<16x1xf32>
    %50 = vector.broadcast %49 : vector<16x1xf32> to vector<16x16xf32>
    %51 = arith.subf %47, %50 : vector<16x16xf32>
    %52 = math.exp %51 : vector<16x16xf32>
    %cst_22 = arith.constant dense<0.000000e+00> : vector<16xf32>
    %53 = vector.multi_reduction <add>, %52, %cst_22 [1] : vector<16x16xf32> to vector<16xf32>
    %54 = vector.shape_cast %53 : vector<16xf32> to vector<16x1xf32>
    %55 = tpu.reciprocal %54 {approx = true} : vector<16x1xf32> -> vector<16x1xf32>
    %56 = vector.broadcast %55 : vector<16x1xf32> to vector<16x16xf32>
    %57 = arith.mulf %52, %56 : vector<16x16xf32>
    %cst_23 = arith.constant dense<0.000000e+00> : vector<16x32xf32>
    %58 = tpu.matmul %57, %46, %cst_23 {dimension_numbers = #tpu.dot_dimension_numbers<[1], [0], [0], [1], [0, 0, 1, 1], [], []>} : vector<16x16xf32>, vector<16x32xf32>, vector<16x32xf32> -> vector<16x32xf32>
    %c64 = arith.constant 64 : index
    %c0_24 = arith.constant 0 : index
    %59 = vector.load %arg4[%c64, %c0_24] : memref<128x128xf32, #tpu.memory_space<vmem>>, vector<32x128xf32>
    %cst_25 = arith.constant dense<0.000000e+00> : vector<16x128xf32>
    %60 = tpu.matmul %58, %59, %cst_25 {dimension_numbers = #tpu.dot_dimension_numbers<[1], [0], [0], [1], [0, 0, 1, 1], [], []>} : vector<16x32xf32>, vector<32x128xf32>, vector<16x128xf32> -> vector<16x128xf32>
    %61 = arith.addf %43, %60 : vector<16x128xf32>
    %62 = vector.extract_strided_slice %6 {offsets = [0, 96], sizes = [16, 32], strides = [1, 1]} : vector<16x384xf32> to vector<16x32xf32>
    %63 = vector.extract_strided_slice %6 {offsets = [0, 224], sizes = [16, 32], strides = [1, 1]} : vector<16x384xf32> to vector<16x32xf32>
    %64 = vector.extract_strided_slice %6 {offsets = [0, 352], sizes = [16, 32], strides = [1, 1]} : vector<16x384xf32> to vector<16x32xf32>
    %cst_26 = arith.constant dense<0.000000e+00> : vector<16x16xf32>
    %65 = tpu.matmul %62, %63, %cst_26 {dimension_numbers = #tpu.dot_dimension_numbers<[1], [1], [0], [0], [0, 0, 1, 0], [], []>} : vector<16x32xf32>, vector<16x32xf32>, vector<16x16xf32> -> vector<16x16xf32>
    %cst_27 = arith.constant dense<0xFF800000> : vector<16xf32>
    %66 = vector.multi_reduction <maximumf>, %65, %cst_27 [1] : vector<16x16xf32> to vector<16xf32>
    %67 = vector.shape_cast %66 : vector<16xf32> to vector<16x1xf32>
    %68 = vector.broadcast %67 : vector<16x1xf32> to vector<16x16xf32>
    %69 = arith.subf %65, %68 : vector<16x16xf32>
    %70 = math.exp %69 : vector<16x16xf32>
    %cst_28 = arith.constant dense<0.000000e+00> : vector<16xf32>
    %71 = vector.multi_reduction <add>, %70, %cst_28 [1] : vector<16x16xf32> to vector<16xf32>
    %72 = vector.shape_cast %71 : vector<16xf32> to vector<16x1xf32>
    %73 = tpu.reciprocal %72 {approx = true} : vector<16x1xf32> -> vector<16x1xf32>
    %74 = vector.broadcast %73 : vector<16x1xf32> to vector<16x16xf32>
    %75 = arith.mulf %70, %74 : vector<16x16xf32>
    %cst_29 = arith.constant dense<0.000000e+00> : vector<16x32xf32>
    %76 = tpu.matmul %75, %64, %cst_29 {dimension_numbers = #tpu.dot_dimension_numbers<[1], [0], [0], [1], [0, 0, 1, 1], [], []>} : vector<16x16xf32>, vector<16x32xf32>, vector<16x32xf32> -> vector<16x32xf32>
    %c96 = arith.constant 96 : index
    %c0_30 = arith.constant 0 : index
    %77 = vector.load %arg4[%c96, %c0_30] : memref<128x128xf32, #tpu.memory_space<vmem>>, vector<32x128xf32>
    %cst_31 = arith.constant dense<0.000000e+00> : vector<16x128xf32>
    %78 = tpu.matmul %76, %77, %cst_31 {dimension_numbers = #tpu.dot_dimension_numbers<[1], [0], [0], [1], [0, 0, 1, 1], [], []>} : vector<16x32xf32>, vector<32x128xf32>, vector<16x128xf32> -> vector<16x128xf32>
    %79 = arith.addf %61, %78 : vector<16x128xf32>
    %c0_32 = arith.constant 0 : index
    %c0_33 = arith.constant 0 : index
    %80 = vector.load %arg5[%c0_32, %c0_33] : memref<1x128xf32, #tpu.memory_space<vmem>>, vector<1x128xf32>
    %81 = vector.broadcast %80 : vector<1x128xf32> to vector<16x128xf32>
    %82 = arith.addf %79, %81 : vector<16x128xf32>
    %83 = arith.addf %1, %82 : vector<16x128xf32>
    %cst_34 = arith.constant dense<0.000000e+00> : vector<16xf32>
    %84 = vector.multi_reduction <add>, %83, %cst_34 [1] : vector<16x128xf32> to vector<16xf32>
    %85 = vector.shape_cast %84 : vector<16xf32> to vector<16x1xf32>
    %cst_35 = arith.constant 1.280000e+02 : f32
    %86 = vector.broadcast %cst_35 : f32 to vector<16x1xf32>
    %87 = arith.divf %85, %86 : vector<16x1xf32>
    %88 = vector.broadcast %87 : vector<16x1xf32> to vector<16x128xf32>
    %89 = arith.subf %83, %88 : vector<16x128xf32>
    %90 = arith.mulf %89, %89 : vector<16x128xf32>
    %cst_36 = arith.constant dense<0.000000e+00> : vector<16xf32>
    %91 = vector.multi_reduction <add>, %90, %cst_36 [1] : vector<16x128xf32> to vector<16xf32>
    %92 = vector.shape_cast %91 : vector<16xf32> to vector<16x1xf32>
    %cst_37 = arith.constant 1.280000e+02 : f32
    %93 = vector.broadcast %cst_37 : f32 to vector<16x1xf32>
    %94 = arith.divf %92, %93 : vector<16x1xf32>
    %95 = vector.broadcast %87 : vector<16x1xf32> to vector<16x128xf32>
    %96 = arith.subf %83, %95 : vector<16x128xf32>
    %cst_38 = arith.constant 9.99999974E-6 : f32
    %97 = vector.broadcast %cst_38 : f32 to vector<16x1xf32>
    %98 = arith.addf %94, %97 : vector<16x1xf32>
    %99 = math.rsqrt %98 : vector<16x1xf32>
    %100 = vector.broadcast %99 : vector<16x1xf32> to vector<16x128xf32>
    %101 = arith.mulf %96, %100 : vector<16x128xf32>
    %c0_39 = arith.constant 0 : index
    %c0_40 = arith.constant 0 : index
    %102 = vector.load %arg10[%c0_39, %c0_40] : memref<1x128xf32, #tpu.memory_space<vmem>>, vector<1x128xf32>
    %103 = vector.broadcast %102 : vector<1x128xf32> to vector<16x128xf32>
    %104 = arith.mulf %101, %103 : vector<16x128xf32>
    %c0_41 = arith.constant 0 : index
    %c0_42 = arith.constant 0 : index
    %105 = vector.load %arg11[%c0_41, %c0_42] : memref<1x128xf32, #tpu.memory_space<vmem>>, vector<1x128xf32>
    %106 = vector.broadcast %105 : vector<1x128xf32> to vector<16x128xf32>
    %107 = arith.addf %104, %106 : vector<16x128xf32>
    %c0_43 = arith.constant 0 : index
    %c0_44 = arith.constant 0 : index
    %108 = vector.load %arg6[%c0_43, %c0_44] : memref<128x512xf32, #tpu.memory_space<vmem>>, vector<128x512xf32>
    %cst_45 = arith.constant dense<0.000000e+00> : vector<16x512xf32>
    %109 = tpu.matmul %107, %108, %cst_45 {dimension_numbers = #tpu.dot_dimension_numbers<[1], [0], [0], [1], [0, 0, 1, 1], [], []>} : vector<16x128xf32>, vector<128x512xf32>, vector<16x512xf32> -> vector<16x512xf32>
    %c0_46 = arith.constant 0 : index
    %c0_47 = arith.constant 0 : index
    %110 = vector.load %arg7[%c0_46, %c0_47] : memref<1x512xf32, #tpu.memory_space<vmem>>, vector<1x512xf32>
    %111 = vector.broadcast %110 : vector<1x512xf32> to vector<16x512xf32>
    %112 = arith.addf %109, %111 : vector<16x512xf32>
    %cst_48 = arith.constant 0.000000e+00 : f32
    %113 = vector.broadcast %cst_48 : f32 to vector<16x512xf32>
    %114 = arith.maximumf %112, %113 : vector<16x512xf32>
    %c0_49 = arith.constant 0 : index
    %c0_50 = arith.constant 0 : index
    %115 = vector.load %arg8[%c0_49, %c0_50] : memref<512x128xf32, #tpu.memory_space<vmem>>, vector<512x128xf32>
    %cst_51 = arith.constant dense<0.000000e+00> : vector<16x128xf32>
    %116 = tpu.matmul %114, %115, %cst_51 {dimension_numbers = #tpu.dot_dimension_numbers<[1], [0], [0], [1], [0, 0, 1, 1], [], []>} : vector<16x512xf32>, vector<512x128xf32>, vector<16x128xf32> -> vector<16x128xf32>
    %c0_52 = arith.constant 0 : index
    %c0_53 = arith.constant 0 : index
    %117 = vector.load %arg9[%c0_52, %c0_53] : memref<1x128xf32, #tpu.memory_space<vmem>>, vector<1x128xf32>
    %118 = vector.broadcast %117 : vector<1x128xf32> to vector<16x128xf32>
    %119 = arith.addf %116, %118 : vector<16x128xf32>
    %120 = arith.addf %107, %119 : vector<16x128xf32>
    %cst_54 = arith.constant dense<0.000000e+00> : vector<16xf32>
    %121 = vector.multi_reduction <add>, %120, %cst_54 [1] : vector<16x128xf32> to vector<16xf32>
    %122 = vector.shape_cast %121 : vector<16xf32> to vector<16x1xf32>
    %cst_55 = arith.constant 1.280000e+02 : f32
    %123 = vector.broadcast %cst_55 : f32 to vector<16x1xf32>
    %124 = arith.divf %122, %123 : vector<16x1xf32>
    %125 = vector.broadcast %124 : vector<16x1xf32> to vector<16x128xf32>
    %126 = arith.subf %120, %125 : vector<16x128xf32>
    %127 = arith.mulf %126, %126 : vector<16x128xf32>
    %cst_56 = arith.constant dense<0.000000e+00> : vector<16xf32>
    %128 = vector.multi_reduction <add>, %127, %cst_56 [1] : vector<16x128xf32> to vector<16xf32>
    %129 = vector.shape_cast %128 : vector<16xf32> to vector<16x1xf32>
    %cst_57 = arith.constant 1.280000e+02 : f32
    %130 = vector.broadcast %cst_57 : f32 to vector<16x1xf32>
    %131 = arith.divf %129, %130 : vector<16x1xf32>
    %132 = vector.broadcast %124 : vector<16x1xf32> to vector<16x128xf32>
    %133 = arith.subf %120, %132 : vector<16x128xf32>
    %cst_58 = arith.constant 9.99999974E-6 : f32
    %134 = vector.broadcast %cst_58 : f32 to vector<16x1xf32>
    %135 = arith.addf %131, %134 : vector<16x1xf32>
    %136 = math.rsqrt %135 : vector<16x1xf32>
    %137 = vector.broadcast %136 : vector<16x1xf32> to vector<16x128xf32>
    %138 = arith.mulf %133, %137 : vector<16x128xf32>
    %c0_59 = arith.constant 0 : index
    %c0_60 = arith.constant 0 : index
    %139 = vector.load %arg12[%c0_59, %c0_60] : memref<1x128xf32, #tpu.memory_space<vmem>>, vector<1x128xf32>
    %140 = vector.broadcast %139 : vector<1x128xf32> to vector<16x128xf32>
    %141 = arith.mulf %138, %140 : vector<16x128xf32>
    %c0_61 = arith.constant 0 : index
    %c0_62 = arith.constant 0 : index
    %142 = vector.load %arg13[%c0_61, %c0_62] : memref<1x128xf32, #tpu.memory_space<vmem>>, vector<1x128xf32>
    %143 = vector.broadcast %142 : vector<1x128xf32> to vector<16x128xf32>
    %144 = arith.addf %141, %143 : vector<16x128xf32>
    %c0_63 = arith.constant 0 : index
    %c0_64 = arith.constant 0 : index
    %c0_65 = arith.constant 0 : index
    %145 = vector.load %arg14[%c0_63, %c0_64, %c0_65] : memref<1x16x128xf32, #tpu.memory_space<vmem>>, vector<1x16x128xf32>
    %146 = vector.shape_cast %145 : vector<1x16x128xf32> to vector<16x128xf32>
    %147 = vector.shape_cast %144 : vector<16x128xf32> to vector<1x16x128xf32>
    tpu.vector_store %arg14[%c0_63, %c0_64, %c0_65], %147 {strides = array<i32>} : memref<1x16x128xf32, #tpu.memory_space<vmem>>, vector<1x16x128xf32>,
    return
  }
  func.func @transform_0(%arg0: i32) -> (i32, i32, i32) {
    %c0_i32 = arith.constant 0 : i32
    %c0_i32_0 = arith.constant 0 : i32
    %c0_i32_1 = arith.constant 0 : i32
    return %arg0, %c0_i32, %c0_i32_0 : i32, i32, i32
  }
  func.func @transform_1(%arg0: i32) -> (i32, i32) {
    %c0_i32 = arith.constant 0 : i32
    %c0_i32_0 = arith.constant 0 : i32
    %c0_i32_1 = arith.constant 0 : i32
    return %c0_i32, %c0_i32_0 : i32, i32
  }
  func.func @transform_2(%arg0: i32) -> (i32, i32) {
    %c0_i32 = arith.constant 0 : i32
    %c0_i32_0 = arith.constant 0 : i32
    %c0_i32_1 = arith.constant 0 : i32
    return %c0_i32, %c0_i32_0 : i32, i32
  }
  func.func @transform_3(%arg0: i32) -> (i32, i32) {
    %c0_i32 = arith.constant 0 : i32
    %c0_i32_0 = arith.constant 0 : i32
    %c0_i32_1 = arith.constant 0 : i32
    return %c0_i32, %c0_i32_0 : i32, i32
  }
  func.func @transform_4(%arg0: i32) -> (i32, i32) {
    %c0_i32 = arith.constant 0 : i32
    %c0_i32_0 = arith.constant 0 : i32
    %c0_i32_1 = arith.constant 0 : i32
    return %c0_i32, %c0_i32_0 : i32, i32
  }
  func.func @transform_5(%arg0: i32) -> (i32, i32) {
    %c0_i32 = arith.constant 0 : i32
    %c0_i32_0 = arith.constant 0 : i32
    %c0_i32_1 = arith.constant 0 : i32
    return %c0_i32, %c0_i32_0 : i32, i32
  }
  func.func @transform_6(%arg0: i32) -> (i32, i32) {
    %c0_i32 = arith.constant 0 : i32
    %c0_i32_0 = arith.constant 0 : i32
    %c0_i32_1 = arith.constant 0 : i32
    return %c0_i32, %c0_i32_0 : i32, i32
  }
  func.func @transform_7(%arg0: i32) -> (i32, i32) {
    %c0_i32 = arith.constant 0 : i32
    %c0_i32_0 = arith.constant 0 : i32
    %c0_i32_1 = arith.constant 0 : i32
    return %c0_i32, %c0_i32_0 : i32, i32
  }
  func.func @transform_8(%arg0: i32) -> (i32, i32) {
    %c0_i32 = arith.constant 0 : i32
    %c0_i32_0 = arith.constant 0 : i32
    %c0_i32_1 = arith.constant 0 : i32
    return %c0_i32, %c0_i32_0 : i32, i32
  }
  func.func @transform_9(%arg0: i32) -> (i32, i32) {
    %c0_i32 = arith.constant 0 : i32
    %c0_i32_0 = arith.constant 0 : i32
    %c0_i32_1 = arith.constant 0 : i32
    return %c0_i32, %c0_i32_0 : i32, i32
  }
  func.func @transform_10(%arg0: i32) -> (i32, i32) {
    %c0_i32 = arith.constant 0 : i32
    %c0_i32_0 = arith.constant 0 : i32
    %c0_i32_1 = arith.constant 0 : i32
    return %c0_i32, %c0_i32_0 : i32, i32
  }
  func.func @transform_11(%arg0: i32) -> (i32, i32) {
    %c0_i32 = arith.constant 0 : i32
    %c0_i32_0 = arith.constant 0 : i32
    %c0_i32_1 = arith.constant 0 : i32
    return %c0_i32, %c0_i32_0 : i32, i32
  }
  func.func @transform_12(%arg0: i32) -> (i32, i32) {
    %c0_i32 = arith.constant 0 : i32
    %c0_i32_0 = arith.constant 0 : i32
    %c0_i32_1 = arith.constant 0 : i32
    return %c0_i32, %c0_i32_0 : i32, i32
  }
  func.func @transform_13(%arg0: i32) -> (i32, i32, i32) {
    %c0_i32 = arith.constant 0 : i32
    %c0_i32_0 = arith.constant 0 : i32
    %c0_i32_1 = arith.constant 0 : i32
    return %arg0, %c0_i32, %c0_i32_0 : i32, i32, i32
  }
}

</mosaic_0001>

<bundles_post_ra>
// kernel: encoder_layer_forward.1
= control target key start
LH: loop header
LB: loop body
LE: loop exit
PB: predicated region body
PF: predicated region fallthrough
CT: control target
= control target key end

     0   :  { %s4373_s0 = inlined_call_operand.hbm [shape: f32[2,16,128], index: 0, kind: input, shape index: {}]   ;;  %s4374_s1 = inlined_call_operand.vmem [shape: f32[128,384], index: 1, kind: input, shape index: {}]   ;;  %s4375_s2 = inlined_call_operand.vmem [shape: f32[1,384], index: 2, kind: input, shape index: {}]   ;;  %s4376_s3 = inlined_call_operand.hbm [shape: f32[128,128], index: 3, kind: input, shape index: {}]   ;;  %s4377_s4 = inlined_call_operand.vmem [shape: f32[1,128], index: 4, kind: input, shape index: {}]   ;;  %s4378_s5 = inlined_call_operand.vmem [shape: f32[128,512], index: 5, kind: input, shape index: {}]   ;;  %s4379_s6 = inlined_call_operand.vmem [shape: f32[1,512], index: 6, kind: input, shape index: {}]   ;;  %s4380_s7 = inlined_call_operand.vmem [shape: f32[512,128], index: 7, kind: input, shape index: {}]   ;;  %s4381_s8 = inlined_call_operand.vmem [shape: f32[1,128], index: 8, kind: input, shape index: {}]   ;;  %s4382_s9 = inlined_call_operand.vmem [shape: f32[1,128], index: 9, kind: input, shape index: {}]   ;;  %s4383_s10 = inlined_call_operand.vmem [shape: f32[1,128], index: 10, kind: input, shape index: {}]   ;;  %s4384_s11 = inlined_call_operand.vmem [shape: f32[1,128], index: 11, kind: input, shape index: {}]   ;;  %s4385_s12 = inlined_call_operand.vmem [shape: f32[1,128], index: 12, kind: input, shape index: {}]   ;;  %s4386_s13 = inlined_call_operand.hbm [shape: f32[2,16,128], index: 13, kind: output, shape index: {}]  }
   0x1   :  { %4396 = sst [smem:[#allocation14_spill]] %s4384_s11 }
   0x2   :  { %4397 = sst [smem:[#allocation15_spill]] %s4385_s12 }
   0x3   :  { %4398 = sst [smem:[#allocation16_spill]] %s4386_s13 }
   0x4   :  { %18 = vsyncpa [#allocation3], 0 }
   0x5   :  { %20 = vsyncpa [#allocation3 + $0x1], 0 }
   0x6   :  { %21 = vsyncpa [#allocation6], 0 }
   0x7   :  { %22 = vsyncpa [#allocation4], 0 }
   0x8   :  { %24 = vsyncpa [#allocation4 + $0x1], 0  ;;  %s3450_s25 = smov 0   ;;  %s3452_s26 = smov 0  }
   0x9   :  { %s3454_s27 = smov 0   ;;  %s3456_s28 = smov 0  }
   0xa LB: > { %4399 = sst [smem:[#allocation11_spill]] %s3355_s25  ;;  %s3471_s29 = sadd.s32 4294967295, %s3367_s28   ;;  %s3367_s28 = sphi %s3456_s28, %s4423_s28   ;;  %s3363_s27 = sphi %s3454_s27, %s4426_s27   ;;  %s3359_s26 = sphi %s3452_s26, %s4425_s26   ;;  %s3355_s25 = sphi %s3450_s25, %s4424_s25  }
   0xb   : > { %s2493_s30 = sadd.s32 4294967294, %s3367_s28   ;;  %p50_p0 = scmp.ne.s32.totalorder %s3359_s26, %s3355_s25 }
   0xc   : > { %p4392_p1 = scmp.eq.s32.totalorder %s3471_s29, 0  ;;  %p332_p3 = scmp.eq.s32.totalorder %s2493_s30, 1 }
   0xd   : > { %p2494_p5 = scmp.ge.s32.totalorder %s3367_s28, 1  ;;  %p339_p7 = scmp.lt.s32.totalorder %s3367_s28, 3 }
   0xe   : > { %p3480_p4 = por %p4392_p1, %p50_p0  ;;  %p3485_p6 = por %p332_p3, %p50_p0 }
   0xf   : > { %p3490_p8 = pnand %p2494_p5, %p339_p7  ;;  %s3369_s17 = smov [#allocation5]  }
  0x10   : > { %s4400_s14 = scalar_select %p3480_p4, 1, 0 }
  0x11   : > { %s4401_s15 = scalar_select %p3485_p6, 1, 0 }
  0x12   : > { %s4403_s16 = scalar_select %p3490_p8, 1, 0 }
  0x13   : > { %4402 = sst [smem:[#allocation12_spill]] %s4401_s15  ;;  %s357_s18 = sshll.u32 %s3369_s17, 4  ;;  %s3494_s18 = int_to_ptr.vmem [resolvable:$true] %s357_s18 }
  0x14   : > { %p3112_p9 = pneg %p3490_p8  ;;  %s3506_s20 = sadd.s32 1, %s3367_s28  }
  0x15   : > { %4405 = sst [smem:[#allocation13_spill]] %s3506_s20  ;;  %s37_s21 = sadd.s32 1, %s3363_s27 }
  0x16   : > { %p3501_p11 = pnand %p3112_p9, %p4392_p1  ;;  %s34_s22 = ssub.s32 %s3367_s28, %s3506_s20 }
  0x17   : > { %s3239_s30 = scalar_lea.hbm %s4376_s3, 2048 }
  0x18   : > { %p3240_p12 = scmp.ne.s32.totalorder %s4376_s3, %s3239_s30  ;;  %p3241_p13 = pneg %p3501_p11 }
  0x19   : > { %p3246_p5 = scmp.lt.u32.totalorder %s3239_s30, %s4376_s3 }
  0x1a   : > { %p3242_p0 = pnand %p3241_p13, %p3240_p12 }
  0x1c   : > { %p3243_p3 = pneg %p3242_p0 }
  0x1e   : > { %p3248_p7 = pnand %p3246_p5, %p3243_p3 }
  0x20   : > { %3251 = shalt.err (!%p3248_p7)
}
  0x21   : > { %s3252_s20 = scalar_lea.vmem %s3494_s18, 2048  ;;  %p3260_p2 = scmp.lt.s32.totalorder %s3494_s18, %s3494_s18 }
  0x22   : > { %p3253_p9 = scmp.ne.s32.totalorder %s3494_s18, %s3252_s20  ;;  %p3261_p6 = scmp.lt.s32.totalorder %s3252_s20, %s3252_s20 }
  0x24   : > { %p3255_p10 = pnand %p3253_p9, %p3241_p13  ;;  %p3262_p4 = por %p3261_p6, %p3260_p2 }
  0x26   : > { %p3256_p1 = pneg %p3255_p10 }
  0x28   : > { %p3263_p8 = pnand %p3262_p4, %p3256_p1 }
  0x2a   : > { %3266 = shalt.err (!%p3263_p8)
}
  0x2b   : > { %s4395_s15 = smov 128   ;;  %s3371_s13 = smov 8  }
  0x2c   : > { %3115 = dma.hbm_to_vmem [thread:$0]  (!%p3501_p11), %s4376_s3, 2048, %s3494_s18, [#allocation6], %s4395_s15, %s4395_s15, %s3371_s13  }
  0x2d   : > { %p35_p1 = scmp.eq.s32.totalorder %s34_s22, 0  ;;  %p44_p2 = scmp.ne.s32.totalorder %s3363_s27, %s3359_s26 }
  0x2e   : > { %p45_p4 = scmp.eq.s32.totalorder %s3367_s28, 0  ;;  %p3125_p6 = scmp.lt.s32.totalorder %s3367_s28, 2 }
  0x2f   : > { %s3540_s23 = scalar_select %p35_p1, %s3363_s27, %s37_s21  }
  0x30   : > { %p46_p8 = por %p45_p4, %p44_p2  ;;  %p4406_p10 = scmp.eq.s32.totalorder %s3471_s29, 1 }
  0x31   : > { %s398_s19 = sand.u32 1, %s3363_s27   ;;  %s2547_s30 = sshll.u32 %s3367_s28, 8 }
  0x32   : > { %p3544_p12 = por %p4406_p10, %p44_p2  ;;  %s2497_s17 = sshll.u32 %s398_s19, 4 }
  0x33   : > { %s3553_s25 = scalar_lea.hbm %s4373_s0, %s2547_s30  ;;  %s402_s18 = scalar_lea.vmem [#allocation2], %s2497_s17 }
  0x34   : > { %s409_s21 = sshll.u32 %s402_s18, 4  ;;  %p3555_p11 = pnand %p3125_p6, %p46_p8  ;;  %s3559_s21 = int_to_ptr.vmem [resolvable:$true] %s409_s21 }
  0x35   : > { %s3561_s20 = scalar_lea.sflag [#allocation3], %s398_s19  ;;  %s3267_s15 = scalar_lea.hbm %s3553_s25, 256 }
  0x36   : > { %p3268_p13 = scmp.ne.s32.totalorder %s3553_s25, %s3267_s15  ;;  %p3269_p0 = pneg %p3555_p11 }
  0x37   : > { %s3272_s30 = scalar_lea.hbm %s4373_s0, 512  ;;  %p3273_p7 = scmp.lt.u32.totalorder %s3553_s25, %s4373_s0 }
  0x38   : > { %p3270_p3 = pnand %p3269_p0, %p3268_p13  ;;  %p3274_p9 = scmp.lt.u32.totalorder %s3272_s30, %s3267_s15 }
  0x39   : > { %p3276_p2 = scmp.lt.u32.totalorder %s3267_s15, %s3553_s25 }
  0x3a   : > { %p3271_p5 = pneg %p3270_p3  ;;  %p3275_p1 = por %p3274_p9, %p3273_p7 }
  0x3c   : > { %p3277_p4 = por %p3276_p2, %p3275_p1 }
  0x3e   : > { %p3278_p6 = pnand %p3277_p4, %p3271_p5 }
  0x40   : > { %3281 = shalt.err (!%p3278_p6)
}
  0x41   : > { %s3282_s19 = scalar_lea.vmem %s3559_s21, 256  ;;  %s3372_s11 = smov [#allocation2]  }
  0x42   : > { %p3283_p8 = scmp.ne.s32.totalorder %s3559_s21, %s3282_s19  ;;  %s3287_s12 = sshll.u32 %s3372_s11, 4  ;;  %s3288_s12 = int_to_ptr.vmem [resolvable:$false] %s3287_s12 }
  0x43   : > { %s3289_s17 = scalar_lea.vmem %s3288_s12, 512  ;;  %p3290_p3 = scmp.lt.s32.totalorder %s3559_s21, %s3288_s12 }
  0x44   : > { %p3285_p10 = pnand %p3283_p8, %p3269_p0  ;;  %p3291_p7 = scmp.lt.s32.totalorder %s3289_s17, %s3282_s19 }
  0x46   : > { %p3286_p13 = pneg %p3285_p10  ;;  %p3292_p9 = por %p3291_p7, %p3290_p3 }
  0x48   : > { %p3293_p1 = pnand %p3292_p9, %p3286_p13 }
  0x4a   : > { %3296 = shalt.err (!%p3293_p1)
}
  0x4b   : > { %s4409_s15 = smov 128   ;;  %p4410_p0 = scmp.ne.s32.totalorder %s4403_s16, 0 }
  0x4c   : > { %3119 = dma.hbm_to_vmem [thread:$0]  (!%p3555_p11), %s3553_s25, 256, %s3559_s21, %s3561_s20, %s4409_s15, %s4409_s15, %s3371_s13  }
  0x4d   : > { %421 = sbr.rel (%p4410_p0) target bundleno = 4016 (0xfb0), region = 72  ;;  %s3595_s30 = sand.u32 (!%p4410_p0), 1, %s3359_s26  }
  0x4e   : > { %s2501_s18 = sshll.u32 (!%p4410_p0), %s3595_s30, 4  ;;  %s424_s19 = scalar_lea.sflag (!%p4410_p0), [#allocation3], %s3595_s30 }
  0x4f   : > { %s3601_s22 = scalar_lea.vmem (!%p4410_p0), [#allocation2], %s2501_s18  ;;  %p4411_p5 = scmp.ne.s32.totalorder (!%p4410_p0), %s4400_s14, 0 }
  0x54   : > { %3342 = dma.done.wait (%p4411_p5), %s424_s19, 256  }
  0x55   : > { %3344 = vsyncadd (%p4411_p5), %s424_s19, 4294967040  ;;  %p4412_p11 = scmp.eq.s32.totalorder %s3471_s29, 0 }
  0x57   : > { %3346 = dma.done.wait (%p4412_p11), [#allocation6], 2048   ;;  %p4413_p2 = pmov %p4412_p11 }
  0x58   : > { %v3373_v0 = vmov 0.0   ;;  %v477_v1 = vld [vmem:[%s4374_s1 + $0x8] sm:$0xff]  ;;  %v480_v2 = vld [vmem:[%s4374_s1 + $0x20] sm:$0xff]  ;;  %v479_v5 = vld [vmem:[%s4374_s1 + $0x18] sm:$0xff]  ;;  %v526_v51 = vlaneseq  ;;  %vm693_vm0 = vcmask 261120   ;;  %s3374_s12 = smov 96  }
  0x59   : > { %3348 = vsyncadd (%p4413_p2), [#allocation6], 4294965248  ;;  %605 = vmatprep.mubr.f32.mxu0 %v3373_v0  ;;  %v476_v3 = vld [vmem:[%s4374_s1] sm:$0xff]  ;;  %v2834_v4 = vpack.c.bf16 %v480_v2, %v477_v1  ;;  %v483_v6 = vld [vmem:[%s4374_s1 + $0x38] sm:$0xff]  ;;  %vm781_vm2 = vcmask 130048   ;;  %s3375_s15 = smov 64  }
  0x5a   : > { %v486_v7 = vld [vmem:[%s4374_s1 + $0x50] sm:$0xff]  ;;  %v2836_v8 = vpack.c.bf16 %v479_v5, %v476_v3  ;;  %v485_v11 = vld [vmem:[%s4374_s1 + $0x48] sm:$0xff]  ;;  %v492_v13 = vld [vmem:[%s4374_s1 + $0x80] sm:$0xff]  ;;  %v3718_v52 = vshrl.u32 %v526_v51, 7  ;;  %s4416_s21 = sld [smem:[#allocation14_spill]]  ;;  %s4417_s14 = sld [smem:[#allocation15_spill]] }
  0x5b   : > { %v2838_v9 = vpack.c.bf16 %v486_v7, %v483_v6  ;;  %v482_v10 = vld [vmem:[%s4374_s1 + $0x30] sm:$0xff]  ;;  %v489_v12 = vld [vmem:[%s4374_s1 + $0x68] sm:$0xff]  ;;  %2835 = vmatprep.subr.bf16.mxu0 %v2834_v4  ;;  %v488_v16 = vld [vmem:[%s4374_s1 + $0x60] sm:$0xff]  ;;  %s2548_s11 = sshll.u32 %s3471_s29, 8  ;;  %s473_s17 = scalar_lea.vmem [#allocation7], %s2501_s18 }
  0x5c   : > { %2837 = vmatpush1.bf16.msra.mxu0 %v2836_v8  ;;  %v2840_v14 = vpack.c.bf16 %v485_v11, %v482_v10  ;;  %v2842_v15 = vpack.c.bf16 %v492_v13, %v489_v12  ;;  %v491_v17 = vld [vmem:[%s4374_s1 + $0x78] sm:$0xff]  ;;  %v498_v19 = vld [vmem:[%s4374_s1 + $0xb0] sm:$0xff]  ;;  %v497_v23 = vld [vmem:[%s4374_s1 + $0xa8] sm:$0xff]  ;;  %v528_v61 = vsub.s32 0, %v3718_v52  ;;  %v532_v4 = vsub.s32 1, %v3718_v52  ;;  %s4418_s16 = sld [smem:[#allocation16_spill]] }
  0x5d   : > { %2839 = vmatprep.subr.bf16.mxu0 %v2838_v9  ;;  %v495_v18 = vld [vmem:[%s4374_s1 + $0x98] sm:$0xff]  ;;  %v2844_v20 = vpack.c.bf16 %v491_v17, %v488_v16  ;;  %v494_v22 = vld [vmem:[%s4374_s1 + $0x90] sm:$0xff]  ;;  %v501_v24 = vld [vmem:[%s4374_s1 + $0xc8] sm:$0xff]  ;;  %s2397_s25 = scalar_lea.sflag [#allocation4], %s3595_s30  ;;  %s3377_s29 = smov [#allocation7]  }
  0x5e   : > { %v2846_v21 = vpack.c.bf16 %v498_v19, %v495_v18  ;;  %v504_v25 = vld [vmem:[%s4374_s1 + $0xe0] sm:$0xff]  ;;  %v2848_v27 = vpack.c.bf16 %v497_v23, %v494_v22  ;;  %v503_v30 = vld [vmem:[%s4374_s1 + $0xd8] sm:$0xff]  ;;  %v510_v32 = vld [vmem:[%s4374_s1 + $0x110] sm:$0xff]  ;;  %s3301_s18 = sshll.u32 %s3377_s29, 4  ;;  %s3302_s18 = int_to_ptr.vmem [resolvable:$false] %s3301_s18 }
  0x5f   : > { %v3667_v26 = vld [vmem:[%s3601_s22] sm:$0xff]  ;;  %v2850_v28 = vpack.c.bf16 %v504_v25, %v501_v24  ;;  %v507_v31 = vld [vmem:[%s4374_s1 + $0xf8] sm:$0xff]  ;;  %v509_v36 = vld [vmem:[%s4374_s1 + $0x108] sm:$0xff] }
  0x60   : > { %2841 = vmatpush1.bf16.msra.mxu0 %v2840_v14  ;;  %2731 = vmatprep.mubr.f32.mxu1 %v3667_v26  ;;  %v500_v29 = vld [vmem:[%s4374_s1 + $0xc0] sm:$0xff]  ;;  %v2854_v34 = vpack.c.bf16 %v510_v32, %v507_v31  ;;  %v506_v35 = vld [vmem:[%s4374_s1 + $0xf0] sm:$0xff]  ;;  %v513_v37 = vld [vmem:[%s4374_s1 + $0x128] sm:$0xff] }
  0x61   : > { %2843 = vmatprep.subr.bf16.mxu0 %v2842_v15  ;;  %v2852_v33 = vpack.c.bf16 %v503_v30, %v500_v29  ;;  %v516_v38 = vld [vmem:[%s4374_s1 + $0x140] sm:$0xff]  ;;  %v2856_v39 = vpack.c.bf16 %v509_v36, %v506_v35  ;;  %v515_v42 = vld [vmem:[%s4374_s1 + $0x138] sm:$0xff]  ;;  %v522_v44 = vld [vmem:[%s4374_s1 + $0x170] sm:$0xff]  ;;  %v536_v35 = vsub.s32 2, %v3718_v52 }
  0x62   : > { %v2858_v40 = vpack.c.bf16 %v516_v38, %v513_v37  ;;  %v512_v41 = vld [vmem:[%s4374_s1 + $0x120] sm:$0xff]  ;;  %v519_v43 = vld [vmem:[%s4374_s1 + $0x158] sm:$0xff]  ;;  %v518_v47 = vld [vmem:[%s4374_s1 + $0x150] sm:$0xff]  ;;  %s4327_s13 = scalar_lea.hbm %s4418_s16, %s2548_s11 }
  0x63   : > { %v2860_v45 = vpack.c.bf16 %v515_v42, %v512_v41  ;;  %v2862_v46 = vpack.c.bf16 %v522_v44, %v519_v43  ;;  %v521_v48 = vld [vmem:[%s4374_s1 + $0x168] sm:$0xff]  ;;  %v478_v53 = vld [vmem:[%s4374_s1 + $0x10] sm:$0xff]  ;;  %v484_v55 = vld [vmem:[%s4374_s1 + $0x40] sm:$0xff] }
  0x64   : > { %2845 = vmatpush1.bf16.msra.mxu0 %v2844_v20  ;;  %v2864_v49 = vpack.c.bf16 %v521_v48, %v518_v47  ;;  %v3715_v50 = vld [vmem:[%s3601_s22 + $0x8] sm:$0xff]  ;;  %v490_v59 = vld [vmem:[%s4374_s1 + $0x70] sm:$0xff]  ;;  %v524_v62 = vld [vmem:[%s4375_s2] sm:$0x7]  ;;  %s3303_s22 = scalar_lea.vmem %s3302_s18, 512 }
  0x65   : > { %2847 = vmatprep.subr.bf16.mxu0 %v2846_v21  ;;  %v481_v54 = vld [vmem:[%s4374_s1 + $0x28] sm:$0xff]  ;;  %v487_v57 = vld [vmem:[%s4374_s1 + $0x58] sm:$0xff]  ;;  %v496_v1 = vld [vmem:[%s4374_s1 + $0xa0] sm:$0xff]  ;;  %v529_v3 = vrot.slane %v524_v62, %v528_v61  ;;  %v533_v11 = vrot.slane %v524_v62, %v532_v4  ;;  %v537_v36 = vrot.slane %v524_v62, %v536_v35 }
  0x66   : > { %v2866_v56 = vpack.c.bf16 %v481_v54, %v478_v53  ;;  %v2870_v58 = vpack.c.bf16 %v487_v57, %v484_v55  ;;  %v493_v60 = vld [vmem:[%s4374_s1 + $0x88] sm:$0xff]  ;;  %v499_v2 = vld [vmem:[%s4374_s1 + $0xb8] sm:$0xff]  ;;  %v502_v6 = vld [vmem:[%s4374_s1 + $0xd0] sm:$0xff] }
  0x67   : > { %v2874_v63 = vpack.c.bf16 %v493_v60, %v490_v59  ;;  %v2878_v5 = vpack.c.bf16 %v499_v2, %v496_v1  ;;  %v505_v7 = vld [vmem:[%s4374_s1 + $0xe8] sm:$0xff]  ;;  %v508_v13 = vld [vmem:[%s4374_s1 + $0x100] sm:$0xff]  ;;  %v511_v14 = vld [vmem:[%s4374_s1 + $0x118] sm:$0xff] }
  0x68   : > { %2849 = vmatpush1.bf16.msra.mxu0 %v2848_v27  ;;  %2867 = vmatprep.subr.bf16.mxu1 %v2866_v56  ;;  %v2882_v12 = vpack.c.bf16 %v505_v7, %v502_v6  ;;  %v2886_v19 = vpack.c.bf16 %v511_v14, %v508_v13  ;;  %vm3773_vm1 = vmpackc.low %vm693_vm0, %vm693_vm0  ;;  %v514_v21 = vld [vmem:[%s4374_s1 + $0x130] sm:$0xff]  ;;  %v517_v22 = vld [vmem:[%s4374_s1 + $0x148] sm:$0xff] }
  0x69   : > { %2851 = vmatprep.subr.bf16.mxu0 %v2850_v28  ;;  %2869 = vmatpush3.bf16.msra.mxu1 %v2866_v56  ;;  %v2890_v25 = vpack.c.bf16 %v517_v22, %v514_v21  ;;  %v520_v27 = vld [vmem:[%s4374_s1 + $0x160] sm:$0xff]  ;;  %v523_v28 = vld [vmem:[%s4374_s1 + $0x178] sm:$0xff] }
  0x6a   : > { %2871 = vmatprep.subr.bf16.mxu1 %v2870_v58  ;;  %v2894_v29 = vpack.c.bf16 %v523_v28, %v520_v27 }
  0x6c   : > { %2853 = vmatpush1.bf16.msra.mxu0 %v2852_v33 }
  0x6d   : > { %2855 = vmatprep.subr.bf16.mxu0 %v2854_v34  ;;  %2873 = vmatpush3.bf16.msra.mxu1 %v2870_v58 }
  0x6e   : > { %2875 = vmatprep.subr.bf16.mxu1 %v2874_v63 }
  0x70   : > { %2857 = vmatpush1.bf16.msra.mxu0 %v2856_v39 }
  0x71   : > { %2859 = vmatprep.subr.bf16.mxu0 %v2858_v40  ;;  %2877 = vmatpush3.bf16.msra.mxu1 %v2874_v63 }
  0x72   : > { %2879 = vmatprep.subr.bf16.mxu1 %v2878_v5 }
  0x74   : > { %2861 = vmatpush1.bf16.msra.mxu0 %v2860_v45 }
  0x75   : > { %2863 = vmatprep.subr.bf16.mxu0 %v2862_v46  ;;  %2881 = vmatpush3.bf16.msra.mxu1 %v2878_v5 }
  0x76   : > { %2883 = vmatprep.subr.bf16.mxu1 %v2882_v12 }
  0x78   : > { %2865 = vmatpush1.bf16.msra.mxu0 %v2864_v49 }
  0x79   : > { %2885 = vmatpush3.bf16.msra.mxu1 %v2882_v12 }
  0x7a   : > { %2887 = vmatprep.subr.bf16.mxu1 %v2886_v19 }
  0x7b   : > { %606 = vmatmul.mubr.f32.vlgmr.msra.gmra.mrb[0].mxu0 %v3667_v26 }
  0x7c   : > { %611 = vmatprep.mubr.f32.mxu0 %v3373_v0 }
  0x7d   : > { %2889 = vmatpush3.bf16.msra.mxu1 %v2886_v19 }
  0x7e   : > { %2891 = vmatprep.subr.bf16.mxu1 %v2890_v25 }
  0x7f   : > { %612 = vmatmul.mubr.f32.gmra.mrb[2].mxu0 %v3715_v50 }
  0x81   : > { %2893 = vmatpush3.bf16.msra.mxu1 %v2890_v25 }
  0x82   : > { %2895 = vmatprep.subr.bf16.mxu1 %v2894_v29 }
  0x85   : > { %2897 = vmatpush3.bf16.msra.mxu1 %v2894_v29 }
  0x88   : > { %2732 = vmatmul.mubr.f32.vlgmr.msra.gmra.mrb[0].mxu1 %v3715_v50 }
 0x14e   : > { %v607_v8 = vpop.f32.mrb[0].mxu0 }
 0x14f   : > { %v3757_v9 = vadd.f32 %v607_v8, %v529_v3  ;;  %v609_v10 = vpop.f32.mrb[1].mxu0 }
 0x150   : > { %v610_v17 = vadd.f32 %v609_v10, %v533_v11 }
 0x151   : > { %889 = vrot.lane.b32.xlu1 %v3757_v9, %s3374_s12  ;;  %2738 = vmatprep.mubr.msk.f32.mxu0 %vm693_vm0, %v3757_v9 }
 0x152   : > { %v613_v15 = vpop.f32.mrb[2].mxu0 }
 0x153   : > { %v615_v16 = vpop.f32.mrb[3].mxu0  ;;  %v3795_v30 = vadd.f32 %v613_v15, %v529_v3 }
 0x154   : > { %v616_v18 = vadd.f32 %v615_v16, %v533_v11 }
 0x156   : > { %v2898_v23 = vpack.c.bf16 %v616_v18, %v610_v17  ;;  %v3783_v24 = vpack.i.bf16 %v616_v18, %v610_v17 }
 0x158   : > { %2900 = vmatprep.subr.msk.bf16.mxu0 %vm3773_vm1, %v2898_v23 }
 0x159   : > { %2903 = vmatpush3.bf16.xpose.msk.msra.mxu0 %vm3773_vm1, %v2898_v23 }
 0x15b   : > { %v2733_v37 = vpop.f32.mrb[0].mxu1 }
 0x15c   : > { %v684_v38 = vpop.f32.mrb[1].mxu1  ;;  %v690_v39 = vadd.f32 %v2733_v37, %v537_v36 }
 0x15d   : > { %v685_v40 = vadd.f32 %v684_v38, %v537_v36  ;;  %v1094_v36 = vld [vmem:[#allocation5 + $0x38] sm:$0xff] }
 0x15f   : > { %v2904_v41 = vpack.c.bf16 %v690_v39, %v685_v40  ;;  %v3825_v12 = vpack.i.bf16 %v690_v39, %v685_v40 }
 0x160   : > { %2739 = vmatmul.mubr.msk.f32.vlgmr.msra.gmra.mrb[4].mxu0 %vm693_vm0, %v3795_v30 }
 0x161   : > { %2905 = vmatprep.subr.bf16.mxu1 %v2904_v41 }
 0x162   : > { %2907 = vmatpush3.bf16.msra.mxu1 %v2904_v41 }
 0x1c3   : > { %v890_v58 = vpop.permute.xlu1 %889 }
 0x233   : > { %v2740_v31 = vpop.f32.mrb[4].mxu0 }
 0x234   : > { %v772_v32 = vpop.f32.mrb[5].mxu0  ;;  %v785_v34 = vsel %vm781_vm2, %v2740_v31, -inf }
 0x235   : > { %v782_v33 = vsel %vm781_vm2, %v772_v32, -inf }
 0x236   : > { %783 = vmax.xlane.f32.xlu0 %v782_v33  ;;  %v1093_v33 = vld [vmem:[#allocation5 + $0x30] sm:$0xff] }
 0x237   : > { %v2922_v37 = vpack.c.bf16 %v1094_v36, %v1093_v33 }
 0x23a   : > { %786 = vmax.xlane.f32.xlu0 %v785_v34 }
 0x250   : > { %3170 = vrot.lane.b32.xlu0 %v3783_v24, %s3374_s12 }
 0x2c3   : > { %v784_v42 = vpop.xlane.xlu0 %783 }
 0x2c4   : > { %v788_v43 = vsub.f32 %v772_v32, %v784_v42  ;;  %v1092_v32 = vld [vmem:[#allocation5 + $0x28] sm:$0xff] }
 0x2c6   : > { %v790_v46 = vmul.f32 1.442695, %v788_v43 }
 0x2c7   : > { %v787_v44 = vpop.xlane.xlu0 %786 }
 0x2c8   : > { %v789_v45 = vsub.f32 %v2740_v31, %v787_v44  ;;  %v1091_v31 = vld [vmem:[#allocation5 + $0x20] sm:$0xff] }
 0x2c9   : > { %v2918_v34 = vpack.c.bf16 %v1092_v32, %v1091_v31 }
 0x2ca   : > { %v792_v47 = vmul.f32 1.442695, %v789_v45 }
 0x2cb   : > { %v3171_v48 = vpop.permute.xlu0 %3170  ;;  %2919 = vmatprep.subr.bf16.mxu0 %v2918_v34 }
 0x2cc   : > { %3199 = vpow2.f32 %v792_v47  ;;  %v3173_v49 = vunpack.i.h.bf16 %v3171_v48  ;;  %v3172_v51 = vunpack.i.l.bf16 %v3171_v48  ;;  %2921 = vmatpush3.bf16.msra.mxu0 %v2918_v34 }
 0x2cd   : > { %3201 = vpow2.f32 %v790_v46  ;;  %2923 = vmatprep.subr.bf16.mxu0 %v2922_v37 }
 0x2ce   : > { %v2908_v53 = vpack.c.bf16 %v3173_v49, %v3172_v51  ;;  %v885_v51 = vld [vmem:[#allocation5] sm:$0xff] }
 0x2d0   : > { %2910 = vmatprep.subr.msk.bf16.mxu1 %vm3773_vm1, %v2908_v53  ;;  %2925 = vmatpush3.bf16.msra.mxu0 %v2922_v37 }
 0x2d6   : > { %v3200_v54 = vpop.eup %3199 }
 0x2d7   : > { %v797_v55 = vsel %vm781_vm2, %v3200_v54, 0.0  ;;  %v3202_v56 = vpop.eup %3201 }
 0x2d8   : > { %798 = vadd.xlane.f32.xlu1 %v797_v55  ;;  %v794_v57 = vsel %vm781_vm2, %v3202_v56, 0.0  ;;  %v887_v55 = vld [vmem:[#allocation5 + $0x10] sm:$0xff] }
 0x2dc   : > { %795 = vadd.xlane.f32.xlu1 %v794_v57 }
 0x2ed   : > { %891 = vrot.lane.b32.xlu1 %v3795_v30, %s3374_s12 }
 0x365   : > { %v799_v59 = vpop.xlane.xlu1 %798 }
 0x366   : > { %3203 = vrcp.f32 %v799_v59 }
 0x369   : > { %v796_v60 = vpop.xlane.xlu1 %795 }
 0x36a   : > { %3205 = vrcp.f32 %v796_v60 }
 0x36d   : > { %v892_v3 = vpop.permute.xlu1 %891 }
 0x370   : > { %v3204_v62 = vpop.eup %3203 }
 0x371   : > { %v803_v2 = vmul.f32 %v3204_v62, %v3200_v54 }
 0x374   : > { %v3206_v63 = vpop.eup %3205 }
 0x375   : > { %v802_v1 = vmul.f32 %v3206_v63, %v3202_v56  ;;  %v888_v56 = vld [vmem:[#allocation5 + $0x18] sm:$0xff] }
 0x376   : > { %v2930_v59 = vpack.c.bf16 %v888_v56, %v887_v55 }
 0x377   : > { %2745 = vmatprep.mubr.msk.f32.mxu1 %vm781_vm2, %v802_v1 }
 0x378   : > { %2746 = vmatmul.mubr.msk.f32.vlgmr.msra.gmra.mrb[2].mxu1 %vm781_vm2, %v803_v2 }
 0x379   : > { %2913 = vmatpush3.bf16.xpose.msk.msra.mxu1 %vm3773_vm1, %v2908_v53  ;;  %2752 = vmatprep.mubr.msk.f32.mxu1 %vm693_vm0, %v890_v58  ;;  %v886_v53 = vld [vmem:[#allocation5 + $0x8] sm:$0xff] }
 0x37a   : > { %v2926_v54 = vpack.c.bf16 %v886_v53, %v885_v51 }
 0x37c   : > { %2927 = vmatprep.subr.bf16.mxu0 %v2926_v54 }
 0x380   : > { %2753 = vmatmul.mubr.msk.f32.vlgmr.msra.gmra.mrb[4].mxu1 %vm693_vm0, %v892_v3 }
 0x44b   : > { %v3819_v5 = vpop.f32.mrb[2].mxu1 }
 0x44c   : > { %v3821_v6 = vpop.f32.mrb[3].mxu1 }
 0x453   : > { %v2754_v7 = vpop.f32.mrb[4].mxu1 }
 0x454   : > { %v971_v8 = vpop.f32.mrb[5].mxu1  ;;  %v983_v10 = vsel %vm781_vm2, %v2754_v7, -inf }
 0x455   : > { %984 = vmax.xlane.f32.xlu0 %v983_v10  ;;  %v980_v11 = vsel %vm781_vm2, %v971_v8, -inf }
 0x456   : > { %981 = vmax.xlane.f32.xlu1 %v980_v11 }
 0x467   : > { %3175 = vrot.lane.b32.xlu1 %v3825_v12, %s3374_s12  ;;  %s3376_s12 = smov 32  }
 0x46b   : > { %1257 = vrot.lane.b32.xlu1 %v3757_v9, %s3375_s15 }
 0x46f   : > { %1259 = vrot.lane.b32.xlu1 %v3795_v30, %s3375_s15 }
 0x4e2   : > { %v985_v13 = vpop.xlane.xlu0 %984 }
 0x4e3   : > { %v987_v14 = vsub.f32 %v2754_v7, %v985_v13  ;;  %v982_v15 = vpop.xlane.xlu1 %981 }
 0x4e4   : > { %v986_v16 = vsub.f32 %v971_v8, %v982_v15 }
 0x4e5   : > { %v990_v17 = vmul.f32 1.442695, %v987_v14 }
 0x4e6   : > { %v988_v18 = vmul.f32 1.442695, %v986_v16 }
 0x4e7   : > { %3207 = vpow2.f32 %v990_v17  ;;  %v3176_v19 = vpop.permute.xlu1 %3175  ;;  %v1457_v17 = vld [vmem:[#allocation5 + $0x40] sm:$0xff] }
 0x4e8   : > { %v3178_v21 = vunpack.i.h.bf16 %v3176_v19  ;;  %v3177_v22 = vunpack.i.l.bf16 %v3176_v19  ;;  %3209 = vpow2.f32 %v988_v18  ;;  %v1458_v18 = vld [vmem:[#allocation5 + $0x48] sm:$0xff]  ;;  %v1459_v19 = vld [vmem:[#allocation5 + $0x50] sm:$0xff] }
 0x4ea   : > { %v2914_v23 = vpack.c.bf16 %v3178_v21, %v3177_v22  ;;  %v2944_v21 = vpack.c.bf16 %v1458_v18, %v1457_v17  ;;  %v1460_v22 = vld [vmem:[#allocation5 + $0x58] sm:$0xff] }
 0x4eb   : > { %v1258_v48 = vpop.permute.xlu1 %1257 }
 0x4ec   : > { %2915 = vmatprep.subr.bf16.mxu1 %v2914_v23 }
 0x4ed   : > { %2917 = vmatpush3.bf16.msra.mxu1 %v2914_v23  ;;  %v2948_v23 = vpack.c.bf16 %v1460_v22, %v1459_v19  ;;  %v1884_v19 = vld [vmem:[%s4378_s5 + $0x8] sm:$0xff]  ;;  %v1886_v22 = vld [vmem:[%s4378_s5 + $0x18] sm:$0xff] }
 0x4ef   : > { %v1260_v49 = vpop.permute.xlu1 %1259 }
 0x4f1   : > { %v3208_v25 = vpop.eup %3207 }
 0x4f2   : > { %v995_v27 = vsel %vm781_vm2, %v3208_v25, 0.0  ;;  %v3210_v28 = vpop.eup %3209 }
 0x4f3   : > { %996 = vadd.xlane.f32.xlu0 %v995_v27  ;;  %v992_v29 = vsel %vm781_vm2, %v3210_v28, 0.0 }
 0x4f7   : > { %993 = vadd.xlane.f32.xlu0 %v992_v29 }
 0x50d   : > { %3180 = vrot.lane.b32.xlu0 %v3783_v24, %s3375_s15 }
 0x580   : > { %v997_v38 = vpop.xlane.xlu0 %996 }
 0x581   : > { %3211 = vrcp.f32 %v997_v38 }
 0x584   : > { %v994_v39 = vpop.xlane.xlu0 %993 }
 0x585   : > { %3213 = vrcp.f32 %v994_v39 }
 0x588   : > { %v3181_v40 = vpop.permute.xlu0 %3180 }
 0x589   : > { %v3183_v41 = vunpack.i.h.bf16 %v3181_v40  ;;  %v3182_v42 = vunpack.i.l.bf16 %v3181_v40 }
 0x58b   : > { %v2934_v43 = vpack.c.bf16 %v3183_v41, %v3182_v42  ;;  %v3212_v44 = vpop.eup %3211 }
 0x58c   : > { %v1001_v47 = vmul.f32 %v3212_v44, %v3208_v25 }
 0x58d   : > { %2936 = vmatprep.subr.msk.bf16.mxu1 %vm3773_vm1, %v2934_v43 }
 0x58f   : > { %v3214_v45 = vpop.eup %3213 }
 0x590   : > { %v1000_v46 = vmul.f32 %v3214_v45, %v3210_v28 }
 0x592   : > { %2759 = vmatprep.mubr.msk.f32.mxu1 %vm781_vm2, %v1000_v46 }
 0x593   : > { %2760 = vmatmul.mubr.msk.f32.vlgmr.msra.gmra.mrb[6].mxu1 %vm781_vm2, %v1001_v47 }
 0x594   : > { %2939 = vmatpush3.bf16.xpose.msk.msra.mxu1 %vm3773_vm1, %v2934_v43  ;;  %2788 = vmatprep.mubr.msk.f32.mxu1 %vm693_vm0, %v1258_v48 }
 0x59b   : > { %2789 = vmatmul.mubr.msk.f32.vlgmr.msra.gmra.mrb[8].mxu1 %vm693_vm0, %v1260_v49 }
 0x666   : > { %v2761_v57 = vpop.f32.mrb[6].mxu1 }
 0x667   : > { %v1082_v58 = vpop.f32.mrb[7].mxu1 }
 0x668   : > { %2770 = vmatprep.mubr.msk.f32.mxu0 %vm693_vm0, %v1082_v58 }
 0x669   : > { %2771 = vmatmul.mubr.msk.f32.vlgmr.msra.gmra.mrb[6].mxu0 %vm693_vm0, %v2761_v57 }
 0x66a   : > { %2929 = vmatpush3.bf16.msra.mxu0 %v2926_v54  ;;  %2781 = vmatprep.mubr.msk.f32.mxu0 %vm693_vm0, %v3821_v6 }
 0x66b   : > { %2931 = vmatprep.subr.bf16.mxu0 %v2930_v59 }
 0x66e   : > { %v2790_v60 = vpop.f32.mrb[8].mxu1  ;;  %2933 = vmatpush3.bf16.msra.mxu0 %v2930_v59  ;;  %v1744_v59 = vld [vmem:[#allocation5 + $0x60] sm:$0xff] }
 0x66f   : > { %v1339_v62 = vpop.f32.mrb[9].mxu1  ;;  %v1351_v63 = vsel %vm781_vm2, %v2790_v60, -inf  ;;  %2945 = vmatprep.subr.bf16.mxu0 %v2944_v21 }
 0x670   : > { %1352 = vmax.xlane.f32.xlu0 %v1351_v63  ;;  %v1348_v1 = vsel %vm781_vm2, %v1339_v62, -inf }
 0x671   : > { %1349 = vmax.xlane.f32.xlu1 %v1348_v1  ;;  %2782 = vmatmul.mubr.msk.f32.vlgmr.msra.gmra.mrb[6].mxu0 %vm693_vm0, %v3819_v5  ;;  %v1747_v1 = vld [vmem:[#allocation5 + $0x78] sm:$0xff] }
 0x672   : > { %2947 = vmatpush3.bf16.msra.mxu0 %v2944_v21  ;;  %v1888_v21 = vld [vmem:[%s4378_s5 + $0x28] sm:$0xff] }
 0x673   : > { %2949 = vmatprep.subr.bf16.mxu0 %v2948_v23 }
 0x676   : > { %2951 = vmatpush3.bf16.msra.mxu0 %v2948_v23  ;;  %v2970_v23 = vpack.c.bf16 %v1888_v21, %v1884_v19  ;;  %v1922_v21 = vld [vmem:[%s4378_s5 + $0x138] sm:$0xff] }
 0x682   : > { %3185 = vrot.lane.b32.xlu1 %v3825_v12, %s3375_s15  ;;  %s2410_s15 = sshll.u32 %s473_s17, 4  ;;  %s4329_s15 = int_to_ptr.vmem [resolvable:$true] %s2410_s15 }
 0x683   : > { %p3304_p10 = scmp.lt.s32.totalorder %s4329_s15, %s3302_s18 }
 0x686   : > { %1544 = vrot.lane.b32.xlu1 %v3757_v9, %s3376_s12 }
 0x68a   : > { %1546 = vrot.lane.b32.xlu1 %v3795_v30, %s3376_s12 }
 0x6fd   : > { %v1353_v2 = vpop.xlane.xlu0 %1352 }
 0x6fe   : > { %v1355_v3 = vsub.f32 %v2790_v60, %v1353_v2  ;;  %v1350_v6 = vpop.xlane.xlu1 %1349  ;;  %v1745_v60 = vld [vmem:[#allocation5 + $0x68] sm:$0xff] }
 0x6ff   : > { %v1354_v7 = vsub.f32 %v1339_v62, %v1350_v6  ;;  %v1746_v62 = vld [vmem:[#allocation5 + $0x70] sm:$0xff]  ;;  %v2962_v63 = vpack.c.bf16 %v1745_v60, %v1744_v59 }
 0x700   : > { %v1358_v8 = vmul.f32 1.442695, %v1355_v3  ;;  %v2966_v2 = vpack.c.bf16 %v1747_v1, %v1746_v62 }
 0x701   : > { %v1356_v10 = vmul.f32 1.442695, %v1354_v7  ;;  %2963 = vmatprep.subr.bf16.mxu0 %v2962_v63 }
 0x702   : > { %3215 = vpow2.f32 %v1358_v8  ;;  %v3186_v11 = vpop.permute.xlu1 %3185 }
 0x703   : > { %v3188_v13 = vunpack.i.h.bf16 %v3186_v11  ;;  %v3187_v5 = vunpack.i.l.bf16 %v3186_v11  ;;  %3217 = vpow2.f32 %v1356_v10 }
 0x705   : > { %v2940_v14 = vpack.c.bf16 %v3188_v13, %v3187_v5 }
 0x706   : > { %v1545_v37 = vpop.permute.xlu1 %1544 }
 0x707   : > { %2941 = vmatprep.subr.bf16.mxu1 %v2940_v14 }
 0x708   : > { %2943 = vmatpush3.bf16.msra.mxu1 %v2940_v14  ;;  %v2536_v14 = vld [vmem:[%s4377_s4] ss:$0 sm:$0xff] }
 0x70a   : > { %v1547_v38 = vpop.permute.xlu1 %1546 }
 0x70c   : > { %v3216_v15 = vpop.eup %3215 }
 0x70d   : > { %v1363_v9 = vsel %vm781_vm2, %v3216_v15, 0.0  ;;  %v3218_v16 = vpop.eup %3217 }
 0x70e   : > { %1364 = vadd.xlane.f32.xlu0 %v1363_v9  ;;  %v1360_v30 = vsel %vm781_vm2, %v3218_v16, 0.0 }
 0x712   : > { %1361 = vadd.xlane.f32.xlu0 %v1360_v30 }
 0x728   : > { %3190 = vrot.lane.b32.xlu0 %v3783_v24, %s3376_s12 }
 0x79b   : > { %v1365_v25 = vpop.xlane.xlu0 %1364 }
 0x79c   : > { %3219 = vrcp.f32 %v1365_v25  ;;  %v1887_v25 = vld [vmem:[%s4378_s5 + $0x20] sm:$0xff] }
 0x79f   : > { %v1362_v27 = vpop.xlane.xlu0 %1361 }
 0x7a0   : > { %3221 = vrcp.f32 %v1362_v27 }
 0x7a3   : > { %v3191_v28 = vpop.permute.xlu0 %3190 }
 0x7a4   : > { %v3193_v29 = vunpack.i.h.bf16 %v3191_v28  ;;  %v3192_v31 = vunpack.i.l.bf16 %v3191_v28 }
 0x7a6   : > { %v2952_v32 = vpack.c.bf16 %v3193_v29, %v3192_v31  ;;  %v3220_v24 = vpop.eup %3219  ;;  %v1885_v29 = vld [vmem:[%s4378_s5 + $0x10] sm:$0xff] }
 0x7a7   : > { %v1369_v36 = vmul.f32 %v3220_v24, %v3216_v15  ;;  %v1889_v31 = vld [vmem:[%s4378_s5 + $0x30] sm:$0xff] }
 0x7a8   : > { %2954 = vmatprep.subr.msk.bf16.mxu1 %vm3773_vm1, %v2952_v32  ;;  %v3004_v24 = vpack.c.bf16 %v1889_v31, %v1885_v29  ;;  %v1924_v29 = vld [vmem:[%s4378_s5 + $0x148] sm:$0xff] }
 0x7a9   : > { %v1928_v31 = vld [vmem:[%s4378_s5 + $0x168] sm:$0xff] }
 0x7aa   : > { %v3222_v33 = vpop.eup %3221 }
 0x7ab   : > { %v1368_v34 = vmul.f32 %v3222_v33, %v3218_v16  ;;  %v1896_v33 = vld [vmem:[%s4378_s5 + $0x68] sm:$0xff] }
 0x7ad   : > { %2795 = vmatprep.mubr.msk.f32.mxu1 %vm781_vm2, %v1368_v34  ;;  %v1894_v34 = vld [vmem:[%s4378_s5 + $0x58] sm:$0xff] }
 0x7ae   : > { %2796 = vmatmul.mubr.msk.f32.vlgmr.msra.gmra.mrb[10].mxu1 %vm781_vm2, %v1369_v36  ;;  %v1898_v36 = vld [vmem:[%s4378_s5 + $0x78] sm:$0xff] }
 0x7af   : > { %2957 = vmatpush3.bf16.xpose.msk.msra.mxu1 %vm3773_vm1, %v2952_v32  ;;  %2813 = vmatprep.mubr.msk.f32.mxu1 %vm693_vm0, %v1545_v37  ;;  %v1892_v32 = vld [vmem:[%s4378_s5 + $0x48] sm:$0xff] }
 0x7b0   : > { %v2974_v37 = vpack.c.bf16 %v1896_v33, %v1892_v32  ;;  %v1926_v32 = vld [vmem:[%s4378_s5 + $0x158] sm:$0xff] }
 0x7b1   : > { %v1930_v33 = vld [vmem:[%s4378_s5 + $0x178] sm:$0xff] }
 0x7b6   : > { %2814 = vmatmul.mubr.msk.f32.vlgmr.msra.gmra.mrb[12].mxu1 %vm693_vm0, %v1547_v38  ;;  %v3006_v38 = vpack.c.bf16 %v1898_v36, %v1894_v34  ;;  %v1923_v34 = vld [vmem:[%s4378_s5 + $0x140] sm:$0xff] }
 0x7b7   : > { %v1927_v36 = vld [vmem:[%s4378_s5 + $0x160] sm:$0xff] }
 0x881   : > { %v2797_v39 = vpop.f32.mrb[10].mxu1 }
 0x882   : > { %v1448_v40 = vpop.f32.mrb[11].mxu1 }
 0x883   : > { %2806 = vmatprep.mubr.msk.f32.mxu0 %vm693_vm0, %v1448_v40  ;;  %v1895_v40 = vld [vmem:[%s4378_s5 + $0x60] sm:$0xff] }
 0x884   : > { %2807 = vmatmul.mubr.msk.f32.vlgmr.msra.gmra.mrb[6].mxu0 %vm693_vm0, %v2797_v39  ;;  %v1891_v39 = vld [vmem:[%s4378_s5 + $0x40] sm:$0xff] }
 0x885   : > { %2965 = vmatpush3.bf16.msra.mxu0 %v2962_v63 }
 0x886   : > { %2967 = vmatprep.subr.bf16.mxu0 %v2966_v2 }
 0x889   : > { %v2815_v41 = vpop.f32.mrb[12].mxu1  ;;  %2969 = vmatpush3.bf16.msra.mxu0 %v2966_v2 }
 0x88a   : > { %v1626_v42 = vpop.f32.mrb[13].mxu1  ;;  %v1638_v43 = vsel %vm781_vm2, %v2815_v41, -inf }
 0x88b   : > { %1639 = vmax.xlane.f32.xlu0 %v1638_v43  ;;  %v1635_v44 = vsel %vm781_vm2, %v1626_v42, -inf  ;;  %v1897_v43 = vld [vmem:[%s4378_s5 + $0x70] sm:$0xff] }
 0x88c   : > { %1636 = vmax.xlane.f32.xlu1 %v1635_v44  ;;  %v1900_v44 = vld [vmem:[%s4378_s5 + $0x88] sm:$0xff] }
 0x89d   : > { %3195 = vrot.lane.b32.xlu1 %v3825_v12, %s3376_s12 }
 0x918   : > { %v1640_v20 = vpop.xlane.xlu0 %1639 }
 0x919   : > { %v1642_v45 = vsub.f32 %v2815_v41, %v1640_v20  ;;  %v1637_v46 = vpop.xlane.xlu1 %1636  ;;  %v1893_v41 = vld [vmem:[%s4378_s5 + $0x50] sm:$0xff]  ;;  %v1904_v20 = vld [vmem:[%s4378_s5 + $0xa8] sm:$0xff] }
 0x91a   : > { %v1641_v47 = vsub.f32 %v1626_v42, %v1637_v46  ;;  %v2976_v42 = vpack.c.bf16 %v1895_v40, %v1891_v39  ;;  %v2978_v46 = vpack.c.bf16 %v1904_v20, %v1900_v44  ;;  %v1925_v39 = vld [vmem:[%s4378_s5 + $0x150] sm:$0xff]  ;;  %v1934_v44 = vld [vmem:[%s4378_s5 + $0x198] sm:$0xff] }
 0x91b   : > { %v1645_v48 = vmul.f32 1.442695, %v1642_v45  ;;  %v3008_v45 = vpack.c.bf16 %v1897_v43, %v1893_v41  ;;  %v1929_v40 = vld [vmem:[%s4378_s5 + $0x170] sm:$0xff]  ;;  %v1932_v41 = vld [vmem:[%s4378_s5 + $0x188] sm:$0xff]  ;;  %v1938_v20 = vld [vmem:[%s4378_s5 + $0x1b8] sm:$0xff] }
 0x91c   : > { %v1643_v49 = vmul.f32 1.442695, %v1641_v47  ;;  %v1902_v47 = vld [vmem:[%s4378_s5 + $0x98] sm:$0xff]  ;;  %v1936_v43 = vld [vmem:[%s4378_s5 + $0x1a8] sm:$0xff] }
 0x91d   : > { %v3196_v51 = vpop.permute.xlu1 %3195 }
 0x91e   : > { %3223 = vpow2.f32 %v1643_v49  ;;  %v3198_v53 = vunpack.i.h.bf16 %v3196_v51  ;;  %v3197_v54 = vunpack.i.l.bf16 %v3196_v51  ;;  %v1899_v49 = vld [vmem:[%s4378_s5 + $0x80] sm:$0xff] }
 0x91f   : > { %3225 = vpow2.f32 %v1645_v48  ;;  %v1906_v48 = vld [vmem:[%s4378_s5 + $0xb8] sm:$0xff] }
 0x920   : > { %v2958_v55 = vpack.c.bf16 %v3198_v53, %v3197_v54  ;;  %v3010_v51 = vpack.c.bf16 %v1906_v48, %v1902_v47  ;;  %v1903_v53 = vld [vmem:[%s4378_s5 + $0xa0] sm:$0xff]  ;;  %v1901_v54 = vld [vmem:[%s4378_s5 + $0x90] sm:$0xff] }
 0x921   : > { %v1931_v47 = vld [vmem:[%s4378_s5 + $0x180] sm:$0xff] }
 0x922   : > { %2959 = vmatprep.subr.bf16.mxu1 %v2958_v55  ;;  %v1935_v48 = vld [vmem:[%s4378_s5 + $0x1a0] sm:$0xff] }
 0x923   : > { %2961 = vmatpush3.bf16.msra.mxu1 %v2958_v55  ;;  %v1905_v55 = vld [vmem:[%s4378_s5 + $0xb0] sm:$0xff] }
 0x924   : > { %2971 = vmatprep.subr.bf16.mxu1 %v2970_v23  ;;  %v1919_v23 = vld [vmem:[%s4378_s5 + $0x120] sm:$0xff] }
 0x928   : > { %v3224_v56 = vpop.eup %3223 }
 0x929   : > { %v1647_v57 = vsel %vm781_vm2, %v3224_v56, 0.0  ;;  %v3226_v58 = vpop.eup %3225 }
 0x92a   : > { %1648 = vadd.xlane.f32.xlu0 %v1647_v57  ;;  %v1650_v12 = vsel %vm781_vm2, %v3226_v58, 0.0  ;;  %v3012_v57 = vpack.c.bf16 %v1905_v55, %v1901_v54  ;;  %v1940_v54 = vld [vmem:[%s4378_s5 + $0x1c8] sm:$0xff] }
 0x92b   : > { %v1944_v55 = vld [vmem:[%s4378_s5 + $0x1e8] sm:$0xff] }
 0x92e   : > { %1651 = vadd.xlane.f32.xlu0 %v1650_v12 }
 0x9b7   : > { %v1649_v3 = vpop.xlane.xlu0 %1648 }
 0x9b8   : > { %3227 = vrcp.f32 %v1649_v3  ;;  %v1908_v3 = vld [vmem:[%s4378_s5 + $0xc8] sm:$0xff] }
 0x9bb   : > { %v1652_v6 = vpop.xlane.xlu0 %1651 }
 0x9bc   : > { %3229 = vrcp.f32 %v1652_v6  ;;  %v1912_v6 = vld [vmem:[%s4378_s5 + $0xe8] sm:$0xff] }
 0x9c2   : > { %v3228_v7 = vpop.eup %3227 }
 0x9c3   : > { %v1655_v8 = vmul.f32 %v3228_v7, %v3224_v56  ;;  %v2980_v56 = vpack.c.bf16 %v1903_v53, %v1899_v49  ;;  %v1910_v7 = vld [vmem:[%s4378_s5 + $0xd8] sm:$0xff]  ;;  %v1933_v49 = vld [vmem:[%s4378_s5 + $0x190] sm:$0xff] }
 0x9c4   : > { %v1937_v53 = vld [vmem:[%s4378_s5 + $0x1b0] sm:$0xff] }
 0x9c5   : > { %2820 = vmatprep.mubr.msk.f32.mxu1 %vm781_vm2, %v1655_v8  ;;  %v2982_v8 = vpack.c.bf16 %v1912_v6, %v1908_v3  ;;  %v1945_v3 = vld [vmem:[%s4378_s5 + $0x1f0] sm:$0xff] }
 0x9c6   : > { %v3230_v10 = vpop.eup %3229 }
 0x9c7   : > { %v1656_v11 = vmul.f32 %v3230_v10, %v3226_v58  ;;  %v1914_v10 = vld [vmem:[%s4378_s5 + $0xf8] sm:$0xff] }
 0x9c9   : > { %2821 = vmatmul.mubr.msk.f32.vlgmr.msra.gmra.mrb[14].mxu1 %vm781_vm2, %v1656_v11  ;;  %v1907_v11 = vld [vmem:[%s4378_s5 + $0xc0] sm:$0xff] }
 0x9ca   : > { %2033 = vmatprep.mubr.f32.mxu1 %v3373_v0 }
 0xa9c   : > { %v2822_v13 = vpop.f32.mrb[14].mxu1 }
 0xa9d   : > { %v1735_v5 = vpop.f32.mrb[15].mxu1 }
 0xa9e   : > { %2831 = vmatprep.mubr.msk.f32.mxu0 %vm693_vm0, %v1735_v5  ;;  %v3014_v5 = vpack.c.bf16 %v1914_v10, %v1910_v7  ;;  %v2148_v10 = vld [vmem:[%s4380_s7 + $0x88] sm:$0xff] }
 0xa9f   : > { %2832 = vmatmul.mubr.msk.f32.vlgmr.msra.gmra.mrb[6].mxu0 %vm693_vm0, %v2822_v13  ;;  %v1911_v13 = vld [vmem:[%s4378_s5 + $0xe0] sm:$0xff] }
 0xaa0   : > { %2110 = vmatprep.mubr.f32.mxu0 %v3373_v0 }
 0xb72   : > { %v2833_v15 = vpop.f32.mrb[6].mxu0 }
 0xb73   : > { %v1820_v9 = vpop.f32.mrb[7].mxu0  ;;  %v1839_v30 = vadd.f32 %v2833_v15, %v2536_v14  ;;  %v1909_v15 = vld [vmem:[%s4378_s5 + $0xd0] sm:$0xff] }
 0xb74   : > { %v1838_v16 = vadd.f32 %v2536_v14, %v1820_v9  ;;  %v2984_v14 = vpack.c.bf16 %v1911_v13, %v1907_v11  ;;  %v1913_v9 = vld [vmem:[%s4378_s5 + $0xf0] sm:$0xff]  ;;  %v2179_v11 = vld [vmem:[%s4380_s7 + $0x180] sm:$0xff] }
 0xb75   : > { %v1841_v18 = vadd.f32 %v1839_v30, %v3715_v50  ;;  %v1883_v50 = vld [vmem:[%s4378_s5] sm:$0xff]  ;;  %v1916_v30 = vld [vmem:[%s4378_s5 + $0x108] sm:$0xff] }
 0xb76   : > { %v1840_v17 = vadd.f32 %v1838_v16, %v3667_v26  ;;  %v1890_v26 = vld [vmem:[%s4378_s5 + $0x38] sm:$0xff]  ;;  %v2972_v28 = vpack.c.bf16 %v1887_v25, %v1883_v50  ;;  %v3016_v16 = vpack.c.bf16 %v1913_v9, %v1909_v15  ;;  %v1917_v25 = vld [vmem:[%s4378_s5 + $0x110] sm:$0xff] }
 0xb77   : > { %v3002_v27 = vpack.c.bf16 %v1890_v26, %v1886_v22  ;;  %v1915_v22 = vld [vmem:[%s4378_s5 + $0x100] sm:$0xff] }
 0xb78   : > { %1842 = vadd.xlane.f32.xlu0 %v1840_v17  ;;  %2973 = vmatpush1.bf16.msra.mxu1 %v2972_v28  ;;  %v2988_v50 = vpack.c.bf16 %v1919_v23, %v1915_v22  ;;  %v2538_v23 = vld [vmem:[%s4383_s10] ss:$0 sm:$0xff] }
 0xb79   : > { %3003 = vmatprep.subr.bf16.mxu0 %v3002_v27  ;;  %2975 = vmatprep.subr.bf16.mxu1 %v2974_v37  ;;  %v1921_v27 = vld [vmem:[%s4378_s5 + $0x130] sm:$0xff]  ;;  %v3022_v37 = vpack.c.bf16 %v1930_v33, %v1926_v32  ;;  %v2182_v32 = vld [vmem:[%s4380_s7 + $0x198] sm:$0xff] }
 0xb7a   : > { %3005 = vmatpush1.bf16.msra.mxu0 %v3004_v24  ;;  %v3020_v28 = vpack.c.bf16 %v1921_v27, %v1917_v25  ;;  %v2990_v24 = vpack.c.bf16 %v1928_v31, %v1924_v29  ;;  %v2163_v25 = vld [vmem:[%s4380_s7 + $0x100] sm:$0xff]  ;;  %v2149_v27 = vld [vmem:[%s4380_s7 + $0x90] sm:$0xff]  ;;  %v2150_v29 = vld [vmem:[%s4380_s7 + $0x98] sm:$0xff] }
 0xb7b   : > { %3007 = vmatprep.subr.bf16.mxu0 %v3006_v38  ;;  %v2992_v38 = vpack.c.bf16 %v1927_v36, %v1923_v34  ;;  %v2181_v31 = vld [vmem:[%s4380_s7 + $0x190] sm:$0xff] }
 0xb7c   : > { %1844 = vadd.xlane.f32.xlu0 %v1841_v18  ;;  %2977 = vmatpush1.bf16.msra.mxu1 %v2976_v42  ;;  %v3024_v42 = vpack.c.bf16 %v1929_v40, %v1925_v39  ;;  %v2134_v39 = vld [vmem:[%s4380_s7 + $0x18] sm:$0xff]  ;;  %v3038_v40 = vpack.c.bf16 %v2150_v29, %v2149_v27  ;;  %v2141_v27 = vld [vmem:[%s4380_s7 + $0x50] sm:$0xff] }
 0xb7d   : > { %2979 = vmatprep.subr.bf16.mxu1 %v2978_v46  ;;  %v3026_v46 = vpack.c.bf16 %v1938_v20, %v1934_v44  ;;  %v2152_v20 = vld [vmem:[%s4380_s7 + $0xa8] sm:$0xff] }
 0xb7e   : > { %3009 = vmatpush1.bf16.msra.mxu0 %v3008_v45  ;;  %v2994_v45 = vpack.c.bf16 %v1936_v43, %v1932_v41  ;;  %v3070_v41 = vpack.c.bf16 %v2182_v32, %v2181_v31  ;;  %v2151_v43 = vld [vmem:[%s4380_s7 + $0xa0] sm:$0xff]  ;;  %v2173_v32 = vld [vmem:[%s4380_s7 + $0x150] sm:$0xff] }
 0xb7f   : > { %3011 = vmatprep.subr.bf16.mxu0 %v3010_v51  ;;  %v2996_v51 = vpack.c.bf16 %v1935_v48, %v1931_v47 }
 0xb80   : > { %2981 = vmatpush1.bf16.msra.mxu1 %v2980_v56  ;;  %v3028_v56 = vpack.c.bf16 %v1937_v53, %v1933_v49  ;;  %v2136_v53 = vld [vmem:[%s4380_s7 + $0x28] sm:$0xff] }
 0xb81   : > { %2983 = vmatprep.subr.bf16.mxu1 %v2982_v8  ;;  %v2147_v8 = vld [vmem:[%s4380_s7 + $0x80] sm:$0xff] }
 0xb82   : > { %3013 = vmatpush1.bf16.msra.mxu0 %v3012_v57  ;;  %v2998_v57 = vpack.c.bf16 %v1944_v55, %v1940_v54  ;;  %v3034_v13 = vpack.c.bf16 %v2148_v10, %v2147_v8  ;;  %v3042_v54 = vpack.c.bf16 %v2152_v20, %v2151_v43  ;;  %v2169_v8 = vld [vmem:[%s4380_s7 + $0x130] sm:$0xff]  ;;  %v2170_v10 = vld [vmem:[%s4380_s7 + $0x138] sm:$0xff]  ;;  %v2144_v43 = vld [vmem:[%s4380_s7 + $0x68] sm:$0xff] }
 0xb83   : > { %3015 = vmatprep.subr.bf16.mxu0 %v3014_v5  ;;  %v2180_v5 = vld [vmem:[%s4380_s7 + $0x188] sm:$0xff] }
 0xb84   : > { %2985 = vmatpush1.bf16.msra.mxu1 %v2984_v14  ;;  %v3066_v14 = vpack.c.bf16 %v2180_v5, %v2179_v11  ;;  %v2155_v11 = vld [vmem:[%s4380_s7 + $0xc0] sm:$0xff] }
 0xb85   : > { %v2187_v5 = vld [vmem:[%s4380_s7 + $0x1c0] sm:$0xff] }
 0xb86   : > { %3017 = vmatpush1.bf16.msra.mxu0 %v3016_v16 }
 0xc05   : > { %v1843_v58 = vpop.xlane.xlu0 %1842 }
 0xc06   : > { %v1847_v12 = vmul.f32 0.0078125, %v1843_v58  ;;  %v1942_v58 = vld [vmem:[%s4378_s5 + $0x1d8] sm:$0xff] }
 0xc08   : > { %v3962_v59 = vsub.f32 %v1840_v17, %v1847_v12  ;;  %v1920_v17 = vld [vmem:[%s4378_s5 + $0x128] sm:$0xff]  ;;  %v1946_v12 = vld [vmem:[%s4378_s5 + $0x1f8] sm:$0xff] }
 0xc09   : > { %v1845_v60 = vpop.xlane.xlu0 %1844  ;;  %v2986_v19 = vpack.c.bf16 %v1920_v17, %v1916_v30 }
 0xc0a   : > { %v1848_v62 = vmul.f32 0.0078125, %v1845_v60  ;;  %v1851_v63 = vmul.f32 %v3962_v59, %v3962_v59  ;;  %v1939_v60 = vld [vmem:[%s4378_s5 + $0x1c0] sm:$0xff] }
 0xc0b   : > { %2987 = vmatprep.subr.bf16.mxu1 %v2986_v19 }
 0xc0c   : > { %v3966_v1 = vsub.f32 %v1841_v18, %v1848_v62  ;;  %1853 = vadd.xlane.f32.xlu0 %v1851_v63  ;;  %v1918_v18 = vld [vmem:[%s4378_s5 + $0x118] sm:$0xff]  ;;  %2989 = vmatpush1.bf16.msra.mxu1 %v2988_v50  ;;  %v3030_v62 = vpack.c.bf16 %v1946_v12, %v1942_v58  ;;  %v1943_v63 = vld [vmem:[%s4378_s5 + $0x1e0] sm:$0xff]  ;;  %v2132_v50 = vld [vmem:[%s4380_s7 + $0x8] sm:$0xff] }
 0xc0d   : > { %v3018_v26 = vpack.c.bf16 %v1922_v21, %v1918_v18  ;;  %2991 = vmatprep.subr.bf16.mxu1 %v2990_v24  ;;  %v3000_v6 = vpack.c.bf16 %v1943_v63, %v1939_v60  ;;  %v2537_v21 = vld [vmem:[%s4382_s9] ss:$0 sm:$0xff]  ;;  %v2154_v58 = vld [vmem:[%s4380_s7 + $0xb8] sm:$0xff]  ;;  %v2185_v12 = vld [vmem:[%s4380_s7 + $0x1b0] sm:$0xff] }
 0xc0e   : > { %v1852_v2 = vmul.f32 %v3966_v1, %v3966_v1  ;;  %v2186_v60 = vld [vmem:[%s4380_s7 + $0x1b8] sm:$0xff] }
 0xc0f   : > { %3019 = vmatprep.subr.bf16.mxu0 %v3018_v26  ;;  %v2131_v26 = vld [vmem:[%s4380_s7] sm:$0xff] }
 0xc10   : > { %1855 = vadd.xlane.f32.xlu0 %v1852_v2  ;;  %3021 = vmatpush1.bf16.msra.mxu0 %v3020_v28  ;;  %v1941_v2 = vld [vmem:[%s4378_s5 + $0x1d0] sm:$0xff]  ;;  %v3036_v36 = vpack.c.bf16 %v2132_v50, %v2131_v26  ;;  %v2190_v50 = vld [vmem:[%s4380_s7 + $0x1d8] sm:$0xff] }
 0xc11   : > { %3023 = vmatprep.subr.bf16.mxu0 %v3022_v37  ;;  %2993 = vmatpush1.bf16.msra.mxu1 %v2992_v38  ;;  %v3032_v7 = vpack.c.bf16 %v1945_v3, %v1941_v2  ;;  %v2133_v38 = vld [vmem:[%s4380_s7 + $0x10] sm:$0xff]  ;;  %v2138_v3 = vld [vmem:[%s4380_s7 + $0x38] sm:$0xff] }
 0xc12   : > { %2995 = vmatprep.subr.bf16.mxu1 %v2994_v45  ;;  %v2183_v45 = vld [vmem:[%s4380_s7 + $0x1a0] sm:$0xff]  ;;  %v3040_v48 = vpack.c.bf16 %v2134_v39, %v2133_v38  ;;  %v2137_v2 = vld [vmem:[%s4380_s7 + $0x30] sm:$0xff]  ;;  %v2192_v38 = vld [vmem:[%s4380_s7 + $0x1e8] sm:$0xff] }
 0xc13   : > { %v2189_v26 = vld [vmem:[%s4380_s7 + $0x1d0] sm:$0xff] }
 0xc14   : > { %3025 = vmatpush1.bf16.msra.mxu0 %v3024_v42  ;;  %v2165_v42 = vld [vmem:[%s4380_s7 + $0x110] sm:$0xff]  ;;  %v3086_v31 = vpack.c.bf16 %v2190_v50, %v2189_v26 }
 0xc15   : > { %3027 = vmatprep.subr.bf16.mxu0 %v3026_v46  ;;  %2997 = vmatpush1.bf16.msra.mxu1 %v2996_v51  ;;  %v2184_v46 = vld [vmem:[%s4380_s7 + $0x1a8] sm:$0xff]  ;;  %v2135_v51 = vld [vmem:[%s4380_s7 + $0x20] sm:$0xff] }
 0xc16   : > { %2999 = vmatprep.subr.bf16.mxu1 %v2998_v57  ;;  %v3074_v55 = vpack.c.bf16 %v2184_v46, %v2183_v45  ;;  %v2153_v57 = vld [vmem:[%s4380_s7 + $0xb0] sm:$0xff]  ;;  %v2176_v45 = vld [vmem:[%s4380_s7 + $0x168] sm:$0xff] }
 0xc18   : > { %3029 = vmatpush1.bf16.msra.mxu0 %v3028_v56  ;;  %v2168_v56 = vld [vmem:[%s4380_s7 + $0x128] sm:$0xff] }
 0xc19   : > { %3031 = vmatprep.subr.bf16.mxu0 %v3030_v62  ;;  %3001 = vmatpush1.bf16.msra.mxu1 %v3000_v6  ;;  %v3044_v62 = vpack.c.bf16 %v2136_v53, %v2135_v51  ;;  %v3046_v6 = vpack.c.bf16 %v2154_v58, %v2153_v57  ;;  %v2193_v51 = vld [vmem:[%s4380_s7 + $0x1f0] sm:$0xff] }
 0xc1a   : > { %3035 = vmatprep.subr.bf16.mxu1 %v3034_v13  ;;  %v2156_v13 = vld [vmem:[%s4380_s7 + $0xc8] sm:$0xff]  ;;  %v2177_v58 = vld [vmem:[%s4380_s7 + $0x170] sm:$0xff] }
 0xc1c   : > { %3033 = vmatpush1.bf16.msra.mxu0 %v3032_v7  ;;  %v3078_v7 = vpack.c.bf16 %v2186_v60, %v2185_v12  ;;  %v2178_v12 = vld [vmem:[%s4380_s7 + $0x178] sm:$0xff] }
 0xc1d   : > { %3067 = vmatprep.subr.bf16.mxu0 %v3066_v14  ;;  %v2188_v14 = vld [vmem:[%s4380_s7 + $0x1c8] sm:$0xff]  ;;  %v3096_v60 = vpack.c.bf16 %v2178_v12, %v2177_v58 }
 0xc99   : > { %v1854_v15 = vpop.xlane.xlu0 %1853 }
 0xc9a   : > { %v1857_v9 = vmul.f32 0.0078125, %v1854_v15  ;;  %v3048_v15 = vpack.c.bf16 %v2138_v3, %v2137_v2 }
 0xc9c   : > { %v1859_v16 = vadd.f32 1e-05, %v1857_v9  ;;  %v3080_v9 = vpack.c.bf16 %v2170_v10, %v2169_v8 }
 0xc9d   : > { %v1856_v30 = vpop.xlane.xlu0 %1855 }
 0xc9e   : > { %3231 = vrsqrt.f32 %v1859_v16  ;;  %v1858_v17 = vmul.f32 0.0078125, %v1856_v30  ;;  %v2139_v16 = vld [vmem:[%s4380_s7 + $0x40] sm:$0xff]  ;;  %v2140_v30 = vld [vmem:[%s4380_s7 + $0x48] sm:$0xff] }
 0xca0   : > { %v1860_v18 = vadd.f32 1e-05, %v1858_v17  ;;  %v3050_v17 = vpack.c.bf16 %v2156_v13, %v2155_v11 }
 0xca2   : > { %3233 = vrsqrt.f32 %v1860_v18  ;;  %v3082_v18 = vpack.c.bf16 %v2188_v14, %v2187_v5 }
 0xca8   : > { %v3232_v19 = vpop.eup %3231 }
 0xca9   : > { %v1863_v22 = vmul.f32 %v3232_v19, %v3962_v59  ;;  %v2164_v59 = vld [vmem:[%s4380_s7 + $0x108] sm:$0xff]  ;;  %v2171_v19 = vld [vmem:[%s4380_s7 + $0x140] sm:$0xff] }
 0xcaa   : > { %v3068_v37 = vpack.c.bf16 %v2164_v59, %v2163_v25  ;;  %v3052_v25 = vpack.c.bf16 %v2140_v30, %v2139_v16 }
 0xcab   : > { %v1872_v28 = vmul.f32 %v2537_v21, %v1863_v22  ;;  %v2157_v22 = vld [vmem:[%s4380_s7 + $0xd0] sm:$0xff] }
 0xcac   : > { %v3234_v24 = vpop.eup %3233 }
 0xcad   : > { %v4133_v33 = vadd.f32 %v2538_v23, %v1872_v28  ;;  %v1864_v34 = vmul.f32 %v3234_v24, %v3966_v1  ;;  %v2166_v1 = vld [vmem:[%s4380_s7 + $0x118] sm:$0xff] }
 0xcae   : > { %v3072_v49 = vpack.c.bf16 %v2166_v1, %v2165_v42  ;;  %v2142_v28 = vld [vmem:[%s4380_s7 + $0x58] sm:$0xff]  ;;  %v2143_v1 = vld [vmem:[%s4380_s7 + $0x60] sm:$0xff] }
 0xcaf   : > { %2034 = vmatmul.mubr.f32.vlgmr.msra.gmra.mrb[16].mxu1 %v4133_v33  ;;  %2111 = vmatmul.mubr.f32.vlgmr.msra.gmra.mrb[8].mxu0 %v4133_v33  ;;  %v1873_v44 = vmul.f32 %v2537_v21, %v1864_v34  ;;  %v2172_v21 = vld [vmem:[%s4380_s7 + $0x148] sm:$0xff]  ;;  %v2174_v24 = vld [vmem:[%s4380_s7 + $0x158] sm:$0xff]  ;;  %v2159_v34 = vld [vmem:[%s4380_s7 + $0xe0] sm:$0xff]  ;;  %v3056_v39 = vpack.c.bf16 %v2142_v28, %v2141_v27  ;;  %v3060_v20 = vpack.c.bf16 %v2144_v43, %v2143_v1 }
 0xcb0   : > { %2039 = vmatprep.mubr.f32.mxu1 %v3373_v0  ;;  %2116 = vmatprep.mubr.f32.mxu0 %v3373_v0  ;;  %v2167_v0 = vld [vmem:[%s4380_s7 + $0x120] sm:$0xff]  ;;  %v3084_v59 = vpack.c.bf16 %v2172_v21, %v2171_v19 }
 0xcb1   : > { %v4164_v47 = vadd.f32 %v2538_v23, %v1873_v44  ;;  %3037 = vmatpush3.bf16.msra.mxu1 %v3036_v36  ;;  %3069 = vmatpush3.bf16.msra.mxu0 %v3068_v37  ;;  %v3076_v63 = vpack.c.bf16 %v2168_v56, %v2167_v0  ;;  %v2158_v23 = vld [vmem:[%s4380_s7 + $0xd8] sm:$0xff]  ;;  %v2160_v36 = vld [vmem:[%s4380_s7 + $0xe8] sm:$0xff]  ;;  %v2191_v37 = vld [vmem:[%s4380_s7 + $0x1e0] sm:$0xff] }
 0xcb2   : > { %3039 = vmatprep.subr.bf16.mxu1 %v3038_v40  ;;  %3071 = vmatprep.subr.bf16.mxu0 %v3070_v41  ;;  %v3054_v29 = vpack.c.bf16 %v2158_v23, %v2157_v22  ;;  %v3088_v40 = vpack.c.bf16 %v2174_v24, %v2173_v32  ;;  %v3058_v41 = vpack.c.bf16 %v2160_v36, %v2159_v34  ;;  %v2175_v44 = vld [vmem:[%s4380_s7 + $0x160] sm:$0xff]  ;;  %v2146_v0 = vld [vmem:[%s4380_s7 + $0x78] sm:$0xff] }
 0xcb3   : > { %2040 = vmatmul.mubr.f32.gmra.mrb[18].mxu1 %v4164_v47  ;;  %2117 = vmatmul.mubr.f32.gmra.mrb[10].mxu0 %v4164_v47  ;;  %v3090_v42 = vpack.c.bf16 %v2192_v38, %v2191_v37  ;;  %v3092_v46 = vpack.c.bf16 %v2176_v45, %v2175_v44 }
 0xcb5   : > { %3041 = vmatpush3.bf16.msra.mxu1 %v3040_v48  ;;  %3073 = vmatpush3.bf16.msra.mxu0 %v3072_v49  ;;  %v2161_v48 = vld [vmem:[%s4380_s7 + $0xf0] sm:$0xff]  ;;  %v2162_v49 = vld [vmem:[%s4380_s7 + $0xf8] sm:$0xff] }
 0xcb6   : > { %3043 = vmatprep.subr.bf16.mxu1 %v3042_v54  ;;  %3075 = vmatprep.subr.bf16.mxu0 %v3074_v55  ;;  %v3062_v53 = vpack.c.bf16 %v2162_v49, %v2161_v48  ;;  %v2194_v54 = vld [vmem:[%s4380_s7 + $0x1f8] sm:$0xff]  ;;  %v2145_v55 = vld [vmem:[%s4380_s7 + $0x70] sm:$0xff] }
 0xcb7   : > { %v3094_v56 = vpack.c.bf16 %v2194_v54, %v2193_v51  ;;  %v3064_v57 = vpack.c.bf16 %v2146_v0, %v2145_v55 }
 0xcb9   : > { %3045 = vmatpush3.bf16.msra.mxu1 %v3044_v62  ;;  %3077 = vmatpush3.bf16.msra.mxu0 %v3076_v63  ;;  %v1947_v62 = vld [vmem:[%s4379_s6] sm:$0xf]  ;;  %v1963_v63 = vsub.s32 3, %v3718_v52 }
 0xcba   : > { %3047 = vmatprep.subr.bf16.mxu1 %v3046_v6  ;;  %3079 = vmatprep.subr.bf16.mxu0 %v3078_v7  ;;  %v1952_v2 = vrot.slane %v1947_v62, %v528_v61  ;;  %v1960_v3 = vrot.slane %v1947_v62, %v536_v35  ;;  %v1956_v6 = vrot.slane %v1947_v62, %v532_v4 }
 0xcbb   : > { %v1964_v7 = vrot.slane %v1947_v62, %v1963_v63  ;;  %v2540_v62 = vld [vmem:[%s4416_s21] ss:$0 sm:$0xff]  ;;  %s3297_s21 = scalar_lea.vmem %s4329_s15, 256 }
 0xcbc   : > { %p3298_p4 = scmp.ne.s32.totalorder %s4329_s15, %s3297_s21  ;;  %p3305_p13 = scmp.lt.s32.totalorder %s3303_s22, %s3297_s21 }
 0xcbd   : > { %3049 = vmatpush3.bf16.msra.mxu1 %v3048_v15  ;;  %3081 = vmatpush3.bf16.msra.mxu0 %v3080_v9 }
 0xcbe   : > { %3051 = vmatprep.subr.bf16.mxu1 %v3050_v17  ;;  %3083 = vmatprep.subr.bf16.mxu0 %v3082_v18  ;;  %p3299_p6 = pnand %p3298_p4, %p3544_p12  ;;  %p3306_p3 = por %p3305_p13, %p3304_p10 }
 0xcc0   : > { %p3300_p8 = pneg %p3299_p6 }
 0xcc1   : > { %3053 = vmatpush3.bf16.msra.mxu1 %v3052_v25  ;;  %3085 = vmatpush3.bf16.msra.mxu0 %v3084_v59 }
 0xcc2   : > { %3055 = vmatprep.subr.bf16.mxu1 %v3054_v29  ;;  %3087 = vmatprep.subr.bf16.mxu0 %v3086_v31  ;;  %v2539_v29 = vld [vmem:[%s4381_s8] ss:$0 sm:$0xff]  ;;  %p3307_p7 = pnand %p3306_p3, %p3300_p8 }
 0xcc5   : > { %3057 = vmatpush3.bf16.msra.mxu1 %v3056_v39  ;;  %3089 = vmatpush3.bf16.msra.mxu0 %v3088_v40 }
 0xcc6   : > { %3059 = vmatprep.subr.bf16.mxu1 %v3058_v41  ;;  %3091 = vmatprep.subr.bf16.mxu0 %v3090_v42 }
 0xcc9   : > { %3061 = vmatpush3.bf16.msra.mxu1 %v3060_v20  ;;  %3093 = vmatpush3.bf16.msra.mxu0 %v3092_v46 }
 0xcca   : > { %3063 = vmatprep.subr.bf16.mxu1 %v3062_v53  ;;  %3095 = vmatprep.subr.bf16.mxu0 %v3094_v56 }
 0xccd   : > { %3065 = vmatpush3.bf16.msra.mxu1 %v3064_v57  ;;  %3097 = vmatpush3.bf16.msra.mxu0 %v3096_v60 }
 0xd82   : > { %v2035_v8 = vpop.f32.mrb[16].mxu1  ;;  %v2112_v10 = vpop.f32.mrb[8].mxu0 }
 0xd83   : > { %v2036_v11 = vadd.f32 %v2035_v8, %v1952_v2  ;;  %v2113_v13 = vadd.f32 %v2112_v10, %v1960_v3  ;;  %v2037_v5 = vpop.f32.mrb[17].mxu1  ;;  %v2114_v14 = vpop.f32.mrb[9].mxu0 }
 0xd84   : > { %v2038_v15 = vadd.f32 %v2037_v5, %v1956_v6  ;;  %v2115_v9 = vadd.f32 %v2114_v14, %v1964_v7 }
 0xd85   : > { %v2123_v61 = vmax.f32 %v2036_v11, 0.0  ;;  %v2125_v19 = vmax.f32 %v2113_v13, 0.0 }
 0xd86   : > { %v2124_v16 = vmax.f32 %v2038_v15, 0.0  ;;  %v2126_v30 = vmax.f32 %v2115_v9, 0.0  ;;  %v2041_v17 = vpop.f32.mrb[18].mxu1  ;;  %v2118_v18 = vpop.f32.mrb[10].mxu0 }
 0xd87   : > { %v2042_v21 = vadd.f32 %v2041_v17, %v1952_v2  ;;  %v2119_v35 = vadd.f32 %v2118_v18, %v1960_v3  ;;  %v2043_v22 = vpop.f32.mrb[19].mxu1  ;;  %v2120_v52 = vpop.f32.mrb[11].mxu0  ;;  %v2541_v2 = vld [vmem:[%s4417_s14] ss:$0 sm:$0xff] }
 0xd88   : > { %v2044_v4 = vadd.f32 %v2043_v22, %v1956_v6  ;;  %v2121_v23 = vadd.f32 %v2120_v52, %v1964_v7  ;;  %2266 = vmatprep.mubr.f32.mxu1 %v2124_v16  ;;  %2341 = vmatprep.mubr.f32.mxu0 %v2126_v30 }
 0xd89   : > { %2267 = vmatmul.mubr.f32.vlgmr.msra.gmra.mrb[20].mxu1 %v2123_v61  ;;  %2342 = vmatmul.mubr.f32.vlgmr.msra.gmra.mrb[12].mxu0 %v2125_v19  ;;  %v2127_v25 = vmax.f32 %v2042_v21, 0.0  ;;  %v2129_v59 = vmax.f32 %v2119_v35, 0.0 }
 0xd8a   : > { %v2128_v26 = vmax.f32 %v2044_v4, 0.0  ;;  %v2130_v50 = vmax.f32 %v2121_v23, 0.0 }
 0xd8c   : > { %2271 = vmatprep.mubr.f32.mxu1 %v2128_v26  ;;  %2346 = vmatprep.mubr.f32.mxu0 %v2130_v50 }
 0xd8d   : > { %2272 = vmatmul.mubr.f32.gmra.mrb[22].mxu1 %v2127_v25  ;;  %2347 = vmatmul.mubr.f32.gmra.mrb[14].mxu0 %v2129_v59 }
 0xe5c   : > { %v2655_v27 = vpop.f32.mrb[20].mxu1  ;;  %v2693_v28 = vpop.f32.mrb[12].mxu0 }
 0xe5d   : > { %v2656_v31 = vpop.f32.mrb[21].mxu1  ;;  %v2694_v32 = vpop.f32.mrb[13].mxu0 }
 0xe5e   : > { %v2657_v24 = vadd.f32 %v2656_v31, %v2655_v27  ;;  %v2695_v34 = vadd.f32 %v2694_v32, %v2693_v28 }
 0xe60   : > { %v2269_v36 = vadd.f32 %v2657_v24, %v2539_v29  ;;  %v2658_v37 = vpop.f32.mrb[22].mxu1  ;;  %v2696_v38 = vpop.f32.mrb[14].mxu0 }
 0xe61   : > { %v2659_v39 = vpop.f32.mrb[23].mxu1  ;;  %v2697_v40 = vpop.f32.mrb[15].mxu0 }
 0xe62   : > { %v2344_v41 = vadd.f32 %v2695_v34, %v2269_v36  ;;  %v2660_v42 = vadd.f32 %v2659_v39, %v2658_v37  ;;  %v2698_v1 = vadd.f32 %v2697_v40, %v2696_v38 }
 0xe64   : > { %v2274_v43 = vadd.f32 %v2660_v42, %v2539_v29  ;;  %v2352_v44 = vadd.f32 %v2344_v41, %v4133_v33 }
 0xe66   : > { %v2349_v20 = vadd.f32 %v2698_v1, %v2274_v43  ;;  %2354 = vadd.xlane.f32.xlu1 %v2352_v44 }
 0xe68   : > { %v2353_v45 = vadd.f32 %v2349_v20, %v4164_v47 }
 0xe6a   : > { %2356 = vadd.xlane.f32.xlu0 %v2353_v45 }
 0xef3   : > { %v2355_v46 = vpop.xlane.xlu1 %2354 }
 0xef4   : > { %v2358_v48 = vmul.f32 0.0078125, %v2355_v46 }
 0xef6   : > { %v2360_v49 = vsub.f32 %v2352_v44, %v2358_v48 }
 0xef7   : > { %v2357_v51 = vpop.xlane.xlu0 %2356 }
 0xef8   : > { %v2359_v53 = vmul.f32 0.0078125, %v2357_v51  ;;  %v2362_v54 = vmul.f32 %v2360_v49, %v2360_v49 }
 0xefa   : > { %v2361_v55 = vsub.f32 %v2353_v45, %v2359_v53  ;;  %2364 = vadd.xlane.f32.xlu0 %v2362_v54 }
 0xefc   : > { %v2363_v0 = vmul.f32 %v2361_v55, %v2361_v55 }
 0xefe   : > { %2366 = vadd.xlane.f32.xlu0 %v2363_v0 }
 0xf87   : > { %v2365_v56 = vpop.xlane.xlu0 %2364 }
 0xf88   : > { %v2368_v57 = vmul.f32 0.0078125, %v2365_v56 }
 0xf8a   : > { %v2370_v33 = vadd.f32 1e-05, %v2368_v57 }
 0xf8b   : > { %v2367_v58 = vpop.xlane.xlu0 %2366 }
 0xf8c   : > { %3235 = vrsqrt.f32 %v2370_v33  ;;  %v2369_v12 = vmul.f32 0.0078125, %v2367_v58 }
 0xf8e   : > { %v2371_v47 = vadd.f32 1e-05, %v2369_v12 }
 0xf90   : > { %3237 = vrsqrt.f32 %v2371_v47 }
 0xf96   : > { %v3236_v60 = vpop.eup %3235 }
 0xf97   : > { %v2374_v63 = vmul.f32 %v3236_v60, %v2360_v49 }
 0xf99   : > { %v2383_v3 = vmul.f32 %v2540_v62, %v2374_v63 }
 0xf9a   : > { %v3238_v6 = vpop.eup %3237 }
 0xf9b   : > { %v2392_v7 = vadd.f32 %v2541_v2, %v2383_v3  ;;  %v2375_v8 = vmul.f32 %v3238_v6, %v2361_v55 }
 0xf9d   : > { %v2384_v10 = vmul.f32 %v2540_v62, %v2375_v8  ;;  %2394 = vst [vmem:[%s473_s17] sm:$0xff] %v2392_v7 }
 0xf9f   : > { %v2393_v11 = vadd.f32 %v2541_v2, %v2384_v10 }
 0xfa1   : > { %2395 = vst [vmem:[%s473_s17 + $0x8] sm:$0xff] %v2393_v11 }
 0xfa2   : > { %3310 = shalt.err (!%p3307_p7)
}
 0xfa3   : > { %s3311_s20 = scalar_lea.hbm %s4327_s13, 256  ;;  %s3315_s17 = scalar_lea.hbm %s4418_s16, 512 }
 0xfa4   : > { %p3312_p9 = scmp.ne.s32.totalorder %s4327_s13, %s3311_s20  ;;  %p3316_p5 = scmp.lt.u32.totalorder %s4327_s13, %s4418_s16 }
 0xfa5   : > { %p3317_p11 = scmp.lt.u32.totalorder %s3315_s17, %s3311_s20  ;;  %p3319_p4 = scmp.lt.u32.totalorder %s3311_s20, %s4327_s13 }
 0xfa6   : > { %p3313_p1 = pnand %p3312_p9, %p3544_p12 }
 0xfa7   : > { %p3318_p2 = por %p3317_p11, %p3316_p5 }
 0xfa8   : > { %p3314_p0 = pneg %p3313_p1 }
 0xfa9   : > { %p3320_p6 = por %p3319_p4, %p3318_p2 }
 0xfab   : > { %p3321_p8 = pnand %p3320_p6, %p3314_p0 }
 0xfad   : > { %3324 = shalt.err (!%p3321_p8)
}
 0xfae   : > { %s3378_s21 = smov 128   ;;  %s3379_s29 = smov 8  }
 0xfaf   : > { %3110 = dma.vmem_to_hbm [thread:$0]  (%p3544_p12), %s4329_s15, 256, %s4327_s13, %s2397_s25, %s3378_s21, %s3378_s21, %s3379_s29  }
 0xfb0 PF: > { %s4419_s18 = sld [smem:[#allocation11_spill]]  ;;  %s4420_s22 = sld [smem:[#allocation12_spill]] }
 0xfb1   : > { %p4422_p13 = scmp.ge.s32.totalorder %s3367_s28, 2 }
 0xfb6   : > { %s2425_s14 = sand.u32 1, %s4419_s18   ;;  %p4421_p10 = scmp.ne.s32.totalorder %s4420_s22, 0 }
 0xfb7   : > { %s2426_s20 = scalar_lea.sflag [#allocation4], %s2425_s14 }
 0xfb8   : > { %p3121_p3 = pnand %p4422_p13, %p4421_p10 }
 0xfba   : > { %3350 = dma.done.wait (!%p3121_p3), %s2426_s20, 256  }
 0xfbb   : > { %3352 = vsyncadd (!%p3121_p3), %s2426_s20, 4294967040  ;;  %s4423_s28 = sld [smem:[#allocation13_spill]]  ;;  %s4424_s25 = smov %s3359_s26 }
 0xfbc   : > { %s4425_s26 = smov %s3363_s27  ;;  %s4426_s27 = smov %s3540_s23 }
 0xfc1   : > { %p27_p7 = scmp.ge.s32.totalorder %s4423_s28, 4  }
 0xfc3   :  { %29 = sbr.rel (!%p27_p7) target bundleno = 10 (0xa), region = 121 }
 0xfca   :  { %2431 = vsyncpa [#allocation3], 1 }
 0xfcb   :  { %2433 = vsyncpa [#allocation3 + $0x1], 1 }
 0xfcc   :  { %2434 = vsyncpa [#allocation6], 1 }
 0xfcd   :  { %2435 = vsyncpa [#allocation4], 1 }
 0xfce   :  { %2437 = vsyncpa [#allocation4 + $0x1], 1 }

</bundles_post_ra>
